<compile_context>
chip_gen: v6e
topology: v6e:2x2x1
jax: 0.10.0
libtpu: 0.0.40
codegen_flags: <defaults>
</compile_context>

<pallas_src>
import functools

import jax
import jax.numpy as jnp
from jax.experimental import pallas as pl
from jax.experimental.pallas import tpu as pltpu


# ---------------------------------------------------------------------------
# Prologue: audio projection (nn.Linear), hoisted out of the NCE kernel.
# ---------------------------------------------------------------------------
def _linear_kernel(x_ref, w_ref, b_ref, o_ref):
    o_ref[...] = (jnp.dot(x_ref[...], w_ref[...],
                          preferred_element_type=jnp.float32)
                  + b_ref[...]).astype(o_ref.dtype)


def _linear_proj_bf16(x_bf, w_bf, b32, *, tile):
    n, d_in = x_bf.shape
    d_out = w_bf.shape[1]
    return pl.pallas_call(
        _linear_kernel,
        out_shape=jax.ShapeDtypeStruct((n, d_out), jnp.bfloat16),
        grid_spec=pltpu.PrefetchScalarGridSpec(
            num_scalar_prefetch=0,
            grid=(n // tile,),
            in_specs=[
                pl.BlockSpec((tile, d_in), lambda i: (i, 0)),
                pl.BlockSpec((d_in, d_out), lambda i: (0, 0)),
                pl.BlockSpec((1, d_out), lambda i: (0, 0)),
            ],
            out_specs=pl.BlockSpec((tile, d_out), lambda i: (i, 0)),
        ),
        compiler_params=pltpu.CompilerParams(
            dimension_semantics=("parallel",)),
    )(x_bf, w_bf, b32)


# ---------------------------------------------------------------------------
# Main kernel: fused video projection + symmetric InfoNCE loss (2-D tiled).
# Grid = (core, row_tile, col_tile); col axis is fastest.
# ---------------------------------------------------------------------------
def _va_nce_kernel(inv_soft, v_ref, a_pos_ref, a_t_ref, wv_ref, bv_ref,
                   loss_ref, cmax_ref, csum_ref,
                   vproj_ref, pos_ref, rmax_ref, rsum_ref):
    i = pl.program_id(1)          # row tile within this core's shard
    j = pl.program_id(2)          # audio/column tile
    nj = pl.num_programs(2)

    # -- per-core init of the resident output accumulators -------------------
    # (their index_map depends only on the core axis, so they stay resident for
    #  the whole per-core sub-grid and double as accumulators)
    @pl.when((i == 0) & (j == 0))
    def _core_init():
        loss_ref[...] = jnp.zeros_like(loss_ref)
        cmax_ref[...] = jnp.full_like(cmax_ref, -jnp.inf)
        csum_ref[...] = jnp.zeros_like(csum_ref)

    # -- per-row-tile init: fused video projection + positives ---------------
    @pl.when(j == 0)
    def _row_init():
        # bf16 MXU operands, f32 accumulation; 1/soft folded in here so no
        # per-step (tm x tc) scale multiply is needed on the logits.
        v_proj = (jnp.dot(v_ref[...], wv_ref[...],
                          preferred_element_type=jnp.float32)
                  + bv_ref[...]) * inv_soft
        # Positives <v_i, a_i>/soft straight from the projected-audio rows.
        pos_ref[...] = jnp.sum(
            v_proj * a_pos_ref[...].astype(jnp.float32), axis=-1, keepdims=True)
        vproj_ref[...] = v_proj.astype(jnp.bfloat16)
        rmax_ref[...] = jnp.full_like(rmax_ref, -jnp.inf)
        rsum_ref[...] = jnp.zeros_like(rsum_ref)

    # -- (row_tile, col_tile) slab of scaled logits (plain NN MXU matmul) ----
    sim = jnp.dot(vproj_ref[...], a_t_ref[...],
                  preferred_element_type=jnp.float32)

    # Online row-wise LSE (video vs all audio), across column tiles.
    t_rmax = jnp.max(sim, axis=1, keepdims=True)
    new_rmax = jnp.maximum(rmax_ref[...], t_rmax)
    rsum_ref[...] = (rsum_ref[...] * jnp.exp(rmax_ref[...] - new_rmax)
                     + jnp.sum(jnp.exp(sim - new_rmax), axis=1, keepdims=True))
    rmax_ref[...] = new_rmax

    # Online column-wise LSE (audio vs all video), across row tiles / cores.
    # NOTE: second exp pass kept on purpose — rescaling the row-pass exps by
    # exp(rmax - cmax) risks overflow at this temperature (review item 6).
    t_cmax = jnp.max(sim, axis=0, keepdims=True)          # (1, col_tile)
    old_cmax = cmax_ref[j, 0]
    new_cmax = jnp.maximum(old_cmax, t_cmax)
    csum_ref[j, 0] = (csum_ref[j, 0] * jnp.exp(old_cmax - new_cmax)
                      + jnp.sum(jnp.exp(sim - new_cmax), axis=0, keepdims=True))
    cmax_ref[j, 0] = new_cmax

    # -- row-tile finalize: this tile has now seen every audio column --------
    @pl.when(j == nj - 1)
    def _row_final():
        lse_v = rmax_ref[...] + jnp.log(rsum_ref[...])           # (row_tile, 1)
        tile_loss = jnp.sum(lse_v - 2.0 * pos_ref[...], keepdims=True)  # (1, 1)
        loss_ref[...] += tile_loss.reshape(1, 1, 1)


@functools.partial(jax.jit,
                   static_argnames=("soft_param", "row_tile", "col_tile",
                                    "num_core_splits"))
def va_nce_loss(raw_video, raw_audio, wv, bv, wa, ba, *, soft_param,
                row_tile=None, col_tile=None, num_core_splits=2):
    """Fused projections + symmetric NCE loss. Returns a f32 scalar."""
    b, video_dim = raw_video.shape
    b2, audio_dim = raw_audio.shape
    assert b == b2
    common_dim = wv.shape[1]
    assert wa.shape == (audio_dim, common_dim)

    if b % num_core_splits != 0:
        num_core_splits = 1
    rows_per_core = b // num_core_splits
    if row_tile is None:
        row_tile = min(256, rows_per_core)
    if col_tile is None:
        col_tile = min(1024, b)
    assert rows_per_core % row_tile == 0
    assert row_tile % 16 == 0 or (num_core_splits == 1 and row_tile == b), (
        "row_tile must be a multiple of 16 (bf16 sublane packing)")
    assert b % col_tile == 0
    assert col_tile % 128 == 0 or col_tile == b
    nr_per_core = rows_per_core // row_tile
    nc = b // col_tile

    inv_soft = 1.0 / float(soft_param)   # trace-time constant: mul, not div

    bf16, f32 = jnp.bfloat16, jnp.float32
    v_bf = raw_video.astype(bf16)
    a_bf = raw_audio.astype(bf16)
    wv_bf = wv.astype(bf16)
    wa_bf = wa.astype(bf16)
    bv32 = bv.reshape(1, common_dim).astype(f32)
    ba32 = ba.reshape(1, common_dim).astype(f32)

    # ---- prologue: project ALL audio once (removes the step-0 bubble) ------
    a_proj_bf = _linear_proj_bf16(a_bf, wa_bf, ba32, tile=col_tile)  # (b, D)
    a_proj_t = a_proj_bf.T                                           # (D, b)

    def row_map(c, i, j):
        return (c * nr_per_core + i, 0)

    in_specs = [
        pl.BlockSpec((row_tile, video_dim), row_map),                   # video rows
        pl.BlockSpec((row_tile, common_dim), row_map),                  # positive audio rows
        pl.BlockSpec((common_dim, col_tile), lambda c, i, j: (0, j)),   # a_proj^T col tile
        pl.BlockSpec((video_dim, common_dim), lambda c, i, j: (0, 0)),  # wv (grid-invariant)
        pl.BlockSpec((1, common_dim), lambda c, i, j: (0, 0)),          # bv (grid-invariant)
    ]
    out_shape = (
        jax.ShapeDtypeStruct((num_core_splits, 1, 1), f32),             # per-core Σ(lse_v - 2*pos)
        jax.ShapeDtypeStruct((nc, num_core_splits, 1, col_tile), f32),  # per-core col max
        jax.ShapeDtypeStruct((nc, num_core_splits, 1, col_tile), f32),  # per-core col sum
    )
    out_specs = [
        pl.BlockSpec((1, 1, 1), lambda c, i, j: (c, 0, 0)),
        pl.BlockSpec((nc, 1, 1, col_tile), lambda c, i, j: (0, c, 0, 0)),
        pl.BlockSpec((nc, 1, 1, col_tile), lambda c, i, j: (0, c, 0, 0)),
    ]
    scratch_shapes = [
        pltpu.VMEM((row_tile, common_dim), bf16),   # scaled v_proj (bf16 MXU operand)
        pltpu.VMEM((row_tile, 1), f32),             # positives
        pltpu.VMEM((row_tile, 1), f32),             # row-LSE running max
        pltpu.VMEM((row_tile, 1), f32),             # row-LSE running sum
    ]

    # ---- explicit VMEM budget (review item 8) -------------------------------
    def _nbytes(shape, dt):
        n = 1
        for s in shape:
            n *= s
        return n * jnp.dtype(dt).itemsize

    block_bytes = 2 * (_nbytes((row_tile, video_dim), bf16)
                       + _nbytes((row_tile, common_dim), bf16)
                       + _nbytes((common_dim, col_tile), bf16)
                       + _nbytes((video_dim, common_dim), bf16)
                       + _nbytes((1, common_dim), f32)
                       + _nbytes((1, 1, 1), f32)
                       + 2 * _nbytes((nc, 1, 1, col_tile), f32))
    scratch_bytes = (_nbytes((row_tile, common_dim), bf16)
                     + 3 * row_tile * 128 * 4)           # (row_tile,1) pads to 128 lanes
    slab_bytes = 4 * row_tile * col_tile * 4             # sim + exp f32 temporaries
    vmem_budget = block_bytes + scratch_bytes + slab_bytes
    # On v7x (64 MiB physical VMEM) keep row_tile/col_tile so this stays under
    # ~48-56 MiB; on v5e/v6e up to ~100 MiB of the 128 MiB is usable.
    vmem_limit = int(min(128 * 2**20, max(32 * 2**20, 1.5 * vmem_budget)))

    loss_part, cmax, csum = pl.pallas_call(
        functools.partial(_va_nce_kernel, inv_soft),
        out_shape=out_shape,
        grid_spec=pltpu.PrefetchScalarGridSpec(
            num_scalar_prefetch=0,
            grid=(num_core_splits, nr_per_core, nc),
            in_specs=in_specs,
            out_specs=out_specs,
            scratch_shapes=scratch_shapes),
        compiler_params=pltpu.CompilerParams(
            # Leading core axis is independent ("parallel") — this is the axis
            # v7x's two TensorCores shard; row/column axes carry online-LSE
            # state so they must stay sequential ("arbitrary").
            dimension_semantics=("parallel", "arbitrary", "arbitrary"),
            vmem_limit_bytes=vmem_limit),
    )(v_bf, a_proj_bf, a_proj_t, wv_bf, bv32)

    # ---- tiny XLA epilogue: combine per-core online column-LSE partials ----
    m = jnp.max(cmax, axis=1, keepdims=True)
    s = jnp.sum(csum * jnp.exp(cmax - m), axis=1, keepdims=True)
    lse_a = m + jnp.log(s)                                   # covers all b columns
    loss = (jnp.sum(loss_part) + jnp.sum(lse_a)) / b
    return loss.astype(f32)


# ---------------------------------------------------------------------------
# References
# ---------------------------------------------------------------------------
def _reference_loss_f32(raw_video, raw_audio, wv, bv, wa, ba, soft_param):
    v_proj = raw_video @ wv + bv.reshape(1, -1)
    a_proj = raw_audio @ wa + ba.reshape(1, -1)
    sim = (v_proj @ a_proj.T) / soft_param
    sim_pos = jnp.diag(sim)
    lse_v = jax.scipy.special.logsumexp(sim, axis=1)
    lse_a = jax.scipy.special.logsumexp(sim, axis=0)
    return jnp.mean(lse_v - sim_pos) + jnp.mean(lse_a - sim_pos)


def _reference_loss_bf16_matmul(raw_video, raw_audio, wv, bv, wa, ba, soft_param):
    """Mirrors the kernel's precision policy (bf16 matmul operands, f32 math)."""
    bf16, f32 = jnp.bfloat16, jnp.float32
    inv = 1.0 / soft_param
    v_proj = (jnp.dot(raw_video.astype(bf16), wv.astype(bf16),
                      preferred_element_type=f32) + bv.reshape(1, -1)) * inv
    a_proj = (jnp.dot(raw_audio.astype(bf16), wa.astype(bf16),
                      preferred_element_type=f32) + ba.reshape(1, -1)).astype(bf16)
    sim = jnp.dot(v_proj.astype(bf16), a_proj.T, preferred_element_type=f32)
    sim_pos = jnp.sum(v_proj * a_proj.astype(f32), axis=-1)
    lse_v = jax.scipy.special.logsumexp(sim, axis=1)
    lse_a = jax.scipy.special.logsumexp(sim, axis=0)
    return jnp.mean(lse_v - sim_pos) + jnp.mean(lse_a - sim_pos)


if __name__ == "__main__":
    # Small shapes consistent with the module (defaults are 512/1024/512 dims).
    # B=256 is chosen so the demo exercises multiple row tiles per core,
    # multiple column tiles and both core shards of the grid.
    B, VIDEO_DIM, AUDIO_DIM, COMMON_DIM = 256, 128, 256, 128
    SOFT_PARAM = 0.1

    key = jax.random.PRNGKey(0)
    k1, k2, k3, k4, k5, k6 = jax.random.split(key, 6)

    # Synthetic stand-ins for the extractor outputs (see TODO above).
    raw_video_feat = jax.random.normal(k1, (B, VIDEO_DIM), jnp.float32)
    raw_audio_feat = jax.random.normal(k2, (B, AUDIO_DIM), jnp.float32)

    # nn.Linear(video_dim, common_dim) / nn.Linear(audio_dim, common_dim)
    # parameters, stored transposed as (in, out).
    w_video = jax.random.normal(k3, (VIDEO_DIM, COMMON_DIM), jnp.float32) / jnp.sqrt(VIDEO_DIM)
    b_video = 0.01 * jax.random.normal(k4, (1, COMMON_DIM), jnp.float32)
    w_audio = jax.random.normal(k5, (AUDIO_DIM, COMMON_DIM), jnp.float32) / jnp.sqrt(AUDIO_DIM)
    b_audio = 0.01 * jax.random.normal(k6, (1, COMMON_DIM), jnp.float32)

    loss = va_nce_loss(raw_video_feat, raw_audio_feat,
                       w_video, b_video, w_audio, b_audio,
                       soft_param=SOFT_PARAM,
                       row_tile=64, col_tile=128, num_core_splits=2)
    jax.block_until_ready(loss)

    # Tight check vs a reference with the same matmul precision policy.
    ref_bf16 = _reference_loss_bf16_matmul(raw_video_feat, raw_audio_feat,
                                           w_video, b_video, w_audio, b_audio,
                                           SOFT_PARAM)
    # Looser sanity band vs the pure-f32 module math (bf16 operand drift).
    ref_f32 = _reference_loss_f32(raw_video_feat, raw_audio_feat,
                                  w_video, b_video, w_audio, b_audio,
                                  SOFT_PARAM)
    assert jnp.allclose(loss, ref_bf16, rtol=5e-3, atol=1e-1), (loss, ref_bf16)
    assert jnp.allclose(loss, ref_f32, rtol=1e-1, atol=2.0), (loss, ref_f32)

    print("KERNEL_OK")
</pallas_src>

<mosaic_0001>
module attributes {stable_mosaic.version = 11 : i64} {
  func.func @_linear_kernel(%arg0: i32, %arg1: memref<128x256xbf16, #tpu.memory_space<vmem>>, %arg2: memref<256x128xbf16, #tpu.memory_space<vmem>>, %arg3: memref<1x128xf32, #tpu.memory_space<vmem>>, %arg4: memref<128x128xbf16, #tpu.memory_space<vmem>>) attributes {dimension_semantics = [#tpu.dimension_semantics<parallel>], iteration_bounds = array<i64: 2>, scalar_prefetch = 0 : i64, scratch_operands = 0 : i64, tpu.core_type = #tpu.core_type<tc>, window_params = [{transform_indices = @transform_0, window_bounds = array<i64: 128, 256>}, {pipeline_mode = #tpu.pipeline_mode<synchronous>, transform_indices = @transform_1, window_bounds = array<i64: 256, 128>}, {pipeline_mode = #tpu.pipeline_mode<synchronous>, transform_indices = @transform_2, window_bounds = array<i64: 1, 128>}, {transform_indices = @transform_3, window_bounds = array<i64: 128, 128>}]} {
    %c0 = arith.constant 0 : index
    %c0_0 = arith.constant 0 : index
    %0 = vector.load %arg1[%c0, %c0_0] : memref<128x256xbf16, #tpu.memory_space<vmem>>, vector<128x256xbf16>
    %c0_1 = arith.constant 0 : index
    %c0_2 = arith.constant 0 : index
    %1 = vector.load %arg2[%c0_1, %c0_2] : memref<256x128xbf16, #tpu.memory_space<vmem>>, vector<256x128xbf16>
    %cst = arith.constant dense<0.000000e+00> : vector<128x128xf32>
    %2 = tpu.matmul %0, %1, %cst {dimension_numbers = #tpu.dot_dimension_numbers<[1], [0], [0], [1], [0, 0, 1, 1], [], []>} : vector<128x256xbf16>, vector<256x128xbf16>, vector<128x128xf32> -> vector<128x128xf32>
    %c0_3 = arith.constant 0 : index
    %c0_4 = arith.constant 0 : index
    %3 = vector.load %arg3[%c0_3, %c0_4] : memref<1x128xf32, #tpu.memory_space<vmem>>, vector<1x128xf32>
    %4 = vector.broadcast %3 : vector<1x128xf32> to vector<128x128xf32>
    %5 = arith.addf %2, %4 : vector<128x128xf32>
    %6 = arith.truncf %5 : vector<128x128xf32> to vector<128x128xbf16>
    %c0_5 = arith.constant 0 : index
    %c0_6 = arith.constant 0 : index
    %7 = vector.load %arg4[%c0_5, %c0_6] : memref<128x128xbf16, #tpu.memory_space<vmem>>, vector<128x128xbf16>
    tpu.vector_store %arg4[%c0_5, %c0_6], %6 {strides = array<i32>} : memref<128x128xbf16, #tpu.memory_space<vmem>>, vector<128x128xbf16>,
    return
  }
  func.func @transform_0(%arg0: i32) -> (i32, i32) {
    %c0_i32 = arith.constant 0 : i32
    %c0_i32_0 = arith.constant 0 : i32
    return %arg0, %c0_i32 : i32, i32
  }
  func.func @transform_1(%arg0: i32) -> (i32, i32) {
    %c0_i32 = arith.constant 0 : i32
    %c0_i32_0 = arith.constant 0 : i32
    %c0_i32_1 = arith.constant 0 : i32
    return %c0_i32, %c0_i32_0 : i32, i32
  }
  func.func @transform_2(%arg0: i32) -> (i32, i32) {
    %c0_i32 = arith.constant 0 : i32
    %c0_i32_0 = arith.constant 0 : i32
    %c0_i32_1 = arith.constant 0 : i32
    return %c0_i32, %c0_i32_0 : i32, i32
  }
  func.func @transform_3(%arg0: i32) -> (i32, i32) {
    %c0_i32 = arith.constant 0 : i32
    %c0_i32_0 = arith.constant 0 : i32
    return %arg0, %c0_i32 : i32, i32
  }
}

module attributes {stable_mosaic.version = 11 : i64} {
  func.func @_va_nce_kernel(%arg0: i32, %arg1: i32, %arg2: i32, %arg3: memref<64x128xbf16, #tpu.memory_space<vmem>>, %arg4: memref<64x128xbf16, #tpu.memory_space<vmem>>, %arg5: memref<128x128xbf16, #tpu.memory_space<vmem>>, %arg6: memref<128x128xbf16, #tpu.memory_space<vmem>>, %arg7: memref<1x128xf32, #tpu.memory_space<vmem>>, %arg8: memref<1x1x1xf32, #tpu.memory_space<vmem>>, %arg9: memref<2x1x1x128xf32, #tpu.memory_space<vmem>>, %arg10: memref<2x1x1x128xf32, #tpu.memory_space<vmem>>, %arg11: memref<64x128xbf16, #tpu.memory_space<vmem>>, %arg12: memref<64x1xf32, #tpu.memory_space<vmem>>, %arg13: memref<64x1xf32, #tpu.memory_space<vmem>>, %arg14: memref<64x1xf32, #tpu.memory_space<vmem>>) attributes {dimension_semantics = [#tpu.dimension_semantics<parallel>, #tpu.dimension_semantics<arbitrary>, #tpu.dimension_semantics<arbitrary>], iteration_bounds = array<i64: 2, 2, 2>, scalar_prefetch = 0 : i64, scratch_operands = 4 : i64, tpu.core_type = #tpu.core_type<tc>, window_params = [{transform_indices = @transform_0, window_bounds = array<i64: 64, 128>}, {transform_indices = @transform_1, window_bounds = array<i64: 64, 128>}, {transform_indices = @transform_2, window_bounds = array<i64: 128, 128>}, {pipeline_mode = #tpu.pipeline_mode<synchronous>, transform_indices = @transform_3, window_bounds = array<i64: 128, 128>}, {pipeline_mode = #tpu.pipeline_mode<synchronous>, transform_indices = @transform_4, window_bounds = array<i64: 1, 128>}, {transform_indices = @transform_5, window_bounds = array<i64: 1, 1, 1>}, {transform_indices = @transform_6, window_bounds = array<i64: 2, 1, 1, 128>}, {transform_indices = @transform_7, window_bounds = array<i64: 2, 1, 1, 128>}]} {
    %c0_i32 = arith.constant 0 : i32
    %0 = arith.cmpi eq, %arg1, %c0_i32 : i32
    %c0_i32_0 = arith.constant 0 : i32
    %1 = arith.cmpi eq, %arg2, %c0_i32_0 : i32
    %2 = arith.andi %0, %1 : i1
    %3 = arith.extui %2 : i1 to i32
    %c0_i32_1 = arith.constant 0 : i32
    %4 = arith.cmpi ne, %3, %c0_i32_1 : i32
    scf.if %4 {
      %cst_34 = arith.constant 0.000000e+00 : f32
      %57 = vector.broadcast %cst_34 : f32 to vector<1x1x1xf32>
      %c0_35 = arith.constant 0 : index
      %c0_36 = arith.constant 0 : index
      %c0_37 = arith.constant 0 : index
      %58 = vector.load %arg8[%c0_35, %c0_36, %c0_37] : memref<1x1x1xf32, #tpu.memory_space<vmem>>, vector<1x1x1xf32>
      tpu.vector_store %arg8[%c0_35, %c0_36, %c0_37], %57 {strides = array<i32>} : memref<1x1x1xf32, #tpu.memory_space<vmem>>, vector<1x1x1xf32>,
      %cst_38 = arith.constant 0xFF800000 : f32
      %59 = vector.broadcast %cst_38 : f32 to vector<2x1x1x128xf32>
      %c0_39 = arith.constant 0 : index
      %c0_40 = arith.constant 0 : index
      %c0_41 = arith.constant 0 : index
      %c0_42 = arith.constant 0 : index
      %60 = vector.load %arg9[%c0_39, %c0_40, %c0_41, %c0_42] : memref<2x1x1x128xf32, #tpu.memory_space<vmem>>, vector<2x1x1x128xf32>
      tpu.vector_store %arg9[%c0_39, %c0_40, %c0_41, %c0_42], %59 {strides = array<i32>} : memref<2x1x1x128xf32, #tpu.memory_space<vmem>>, vector<2x1x1x128xf32>,
      %cst_43 = arith.constant 0.000000e+00 : f32
      %61 = vector.broadcast %cst_43 : f32 to vector<2x1x1x128xf32>
      %c0_44 = arith.constant 0 : index
      %c0_45 = arith.constant 0 : index
      %c0_46 = arith.constant 0 : index
      %c0_47 = arith.constant 0 : index
      %62 = vector.load %arg10[%c0_44, %c0_45, %c0_46, %c0_47] : memref<2x1x1x128xf32, #tpu.memory_space<vmem>>, vector<2x1x1x128xf32>
      tpu.vector_store %arg10[%c0_44, %c0_45, %c0_46, %c0_47], %61 {strides = array<i32>} : memref<2x1x1x128xf32, #tpu.memory_space<vmem>>, vector<2x1x1x128xf32>,
    } else {
    }
    %c0_i32_2 = arith.constant 0 : i32
    %5 = arith.cmpi eq, %arg2, %c0_i32_2 : i32
    %6 = arith.extui %5 : i1 to i32
    %c0_i32_3 = arith.constant 0 : i32
    %7 = arith.cmpi ne, %6, %c0_i32_3 : i32
    scf.if %7 {
      %c0_34 = arith.constant 0 : index
      %c0_35 = arith.constant 0 : index
      %57 = vector.load %arg3[%c0_34, %c0_35] : memref<64x128xbf16, #tpu.memory_space<vmem>>, vector<64x128xbf16>
      %c0_36 = arith.constant 0 : index
      %c0_37 = arith.constant 0 : index
      %58 = vector.load %arg6[%c0_36, %c0_37] : memref<128x128xbf16, #tpu.memory_space<vmem>>, vector<128x128xbf16>
      %cst_38 = arith.constant dense<0.000000e+00> : vector<64x128xf32>
      %59 = tpu.matmul %57, %58, %cst_38 {dimension_numbers = #tpu.dot_dimension_numbers<[1], [0], [0], [1], [0, 0, 1, 1], [], []>} : vector<64x128xbf16>, vector<128x128xbf16>, vector<64x128xf32> -> vector<64x128xf32>
      %c0_39 = arith.constant 0 : index
      %c0_40 = arith.constant 0 : index
      %60 = vector.load %arg7[%c0_39, %c0_40] : memref<1x128xf32, #tpu.memory_space<vmem>>, vector<1x128xf32>
      %61 = vector.broadcast %60 : vector<1x128xf32> to vector<64x128xf32>
      %62 = arith.addf %59, %61 : vector<64x128xf32>
      %cst_41 = arith.constant 1.000000e+01 : f32
      %63 = vector.broadcast %cst_41 : f32 to vector<64x128xf32>
      %64 = arith.mulf %62, %63 : vector<64x128xf32>
      %c0_42 = arith.constant 0 : index
      %c0_43 = arith.constant 0 : index
      %65 = vector.load %arg4[%c0_42, %c0_43] : memref<64x128xbf16, #tpu.memory_space<vmem>>, vector<64x128xbf16>
      %66 = arith.extf %65 : vector<64x128xbf16> to vector<64x128xf32>
      %67 = arith.mulf %64, %66 : vector<64x128xf32>
      %cst_44 = arith.constant dense<0.000000e+00> : vector<64xf32>
      %68 = vector.multi_reduction <add>, %67, %cst_44 [1] : vector<64x128xf32> to vector<64xf32>
      %69 = vector.shape_cast %68 : vector<64xf32> to vector<64x1xf32>
      %c0_45 = arith.constant 0 : index
      %c0_46 = arith.constant 0 : index
      %70 = vector.load %arg12[%c0_45, %c0_46] : memref<64x1xf32, #tpu.memory_space<vmem>>, vector<64x1xf32>
      tpu.vector_store %arg12[%c0_45, %c0_46], %69 {strides = array<i32>} : memref<64x1xf32, #tpu.memory_space<vmem>>, vector<64x1xf32>,
      %71 = arith.truncf %64 : vector<64x128xf32> to vector<64x128xbf16>
      %c0_47 = arith.constant 0 : index
      %c0_48 = arith.constant 0 : index
      %72 = vector.load %arg11[%c0_47, %c0_48] : memref<64x128xbf16, #tpu.memory_space<vmem>>, vector<64x128xbf16>
      tpu.vector_store %arg11[%c0_47, %c0_48], %71 {strides = array<i32>} : memref<64x128xbf16, #tpu.memory_space<vmem>>, vector<64x128xbf16>,
      %cst_49 = arith.constant 0xFF800000 : f32
      %73 = vector.broadcast %cst_49 : f32 to vector<64x1xf32>
      %c0_50 = arith.constant 0 : index
      %c0_51 = arith.constant 0 : index
      %74 = vector.load %arg13[%c0_50, %c0_51] : memref<64x1xf32, #tpu.memory_space<vmem>>, vector<64x1xf32>
      tpu.vector_store %arg13[%c0_50, %c0_51], %73 {strides = array<i32>} : memref<64x1xf32, #tpu.memory_space<vmem>>, vector<64x1xf32>,
      %cst_52 = arith.constant 0.000000e+00 : f32
      %75 = vector.broadcast %cst_52 : f32 to vector<64x1xf32>
      %c0_53 = arith.constant 0 : index
      %c0_54 = arith.constant 0 : index
      %76 = vector.load %arg14[%c0_53, %c0_54] : memref<64x1xf32, #tpu.memory_space<vmem>>, vector<64x1xf32>
      tpu.vector_store %arg14[%c0_53, %c0_54], %75 {strides = array<i32>} : memref<64x1xf32, #tpu.memory_space<vmem>>, vector<64x1xf32>,
    } else {
    }
    %c0 = arith.constant 0 : index
    %c0_4 = arith.constant 0 : index
    %8 = vector.load %arg11[%c0, %c0_4] : memref<64x128xbf16, #tpu.memory_space<vmem>>, vector<64x128xbf16>
    %c0_5 = arith.constant 0 : index
    %c0_6 = arith.constant 0 : index
    %9 = vector.load %arg5[%c0_5, %c0_6] : memref<128x128xbf16, #tpu.memory_space<vmem>>, vector<128x128xbf16>
    %cst = arith.constant dense<0.000000e+00> : vector<64x128xf32>
    %10 = tpu.matmul %8, %9, %cst {dimension_numbers = #tpu.dot_dimension_numbers<[1], [0], [0], [1], [0, 0, 1, 1], [], []>} : vector<64x128xbf16>, vector<128x128xbf16>, vector<64x128xf32> -> vector<64x128xf32>
    %cst_7 = arith.constant dense<0xFF800000> : vector<64xf32>
    %11 = vector.multi_reduction <maximumf>, %10, %cst_7 [1] : vector<64x128xf32> to vector<64xf32>
    %12 = vector.shape_cast %11 : vector<64xf32> to vector<64x1xf32>
    %c0_8 = arith.constant 0 : index
    %c0_9 = arith.constant 0 : index
    %13 = vector.load %arg13[%c0_8, %c0_9] : memref<64x1xf32, #tpu.memory_space<vmem>>, vector<64x1xf32>
    %14 = arith.maximumf %13, %12 : vector<64x1xf32>
    %c0_10 = arith.constant 0 : index
    %c0_11 = arith.constant 0 : index
    %15 = vector.load %arg14[%c0_10, %c0_11] : memref<64x1xf32, #tpu.memory_space<vmem>>, vector<64x1xf32>
    %c0_12 = arith.constant 0 : index
    %c0_13 = arith.constant 0 : index
    %16 = vector.load %arg13[%c0_12, %c0_13] : memref<64x1xf32, #tpu.memory_space<vmem>>, vector<64x1xf32>
    %17 = arith.subf %16, %14 : vector<64x1xf32>
    %18 = math.exp %17 : vector<64x1xf32>
    %19 = arith.mulf %15, %18 : vector<64x1xf32>
    %20 = vector.broadcast %14 : vector<64x1xf32> to vector<64x128xf32>
    %21 = arith.subf %10, %20 : vector<64x128xf32>
    %22 = math.exp %21 : vector<64x128xf32>
    %cst_14 = arith.constant dense<0.000000e+00> : vector<64xf32>
    %23 = vector.multi_reduction <add>, %22, %cst_14 [1] : vector<64x128xf32> to vector<64xf32>
    %24 = vector.shape_cast %23 : vector<64xf32> to vector<64x1xf32>
    %25 = arith.addf %19, %24 : vector<64x1xf32>
    %c0_15 = arith.constant 0 : index
    %c0_16 = arith.constant 0 : index
    %26 = vector.load %arg14[%c0_15, %c0_16] : memref<64x1xf32, #tpu.memory_space<vmem>>, vector<64x1xf32>
    tpu.vector_store %arg14[%c0_15, %c0_16], %25 {strides = array<i32>} : memref<64x1xf32, #tpu.memory_space<vmem>>, vector<64x1xf32>,
    %c0_17 = arith.constant 0 : index
    %c0_18 = arith.constant 0 : index
    %27 = vector.load %arg13[%c0_17, %c0_18] : memref<64x1xf32, #tpu.memory_space<vmem>>, vector<64x1xf32>
    tpu.vector_store %arg13[%c0_17, %c0_18], %14 {strides = array<i32>} : memref<64x1xf32, #tpu.memory_space<vmem>>, vector<64x1xf32>,
    %cst_19 = arith.constant dense<0xFF800000> : vector<128xf32>
    %28 = vector.multi_reduction <maximumf>, %10, %cst_19 [0] : vector<64x128xf32> to vector<128xf32>
    %29 = vector.shape_cast %28 : vector<128xf32> to vector<1x128xf32>
    %30 = arith.index_cast %arg2 : i32 to index
    %c0_20 = arith.constant 0 : index
    %c0_21 = arith.constant 0 : index
    %c0_22 = arith.constant 0 : index
    %31 = vector.load %arg9[%30, %c0_20, %c0_21, %c0_22] : memref<2x1x1x128xf32, #tpu.memory_space<vmem>>, vector<1x1x1x128xf32>
    %32 = vector.shape_cast %31 : vector<1x1x1x128xf32> to vector<1x128xf32>
    %33 = arith.maximumf %32, %29 : vector<1x128xf32>
    %34 = arith.index_cast %arg2 : i32 to index
    %c0_23 = arith.constant 0 : index
    %c0_24 = arith.constant 0 : index
    %c0_25 = arith.constant 0 : index
    %35 = vector.load %arg10[%34, %c0_23, %c0_24, %c0_25] : memref<2x1x1x128xf32, #tpu.memory_space<vmem>>, vector<1x1x1x128xf32>
    %36 = vector.shape_cast %35 : vector<1x1x1x128xf32> to vector<1x128xf32>
    %37 = arith.subf %32, %33 : vector<1x128xf32>
    %38 = math.exp %37 : vector<1x128xf32>
    %39 = arith.mulf %36, %38 : vector<1x128xf32>
    %40 = vector.broadcast %33 : vector<1x128xf32> to vector<64x128xf32>
    %41 = arith.subf %10, %40 : vector<64x128xf32>
    %42 = math.exp %41 : vector<64x128xf32>
    %cst_26 = arith.constant dense<0.000000e+00> : vector<128xf32>
    %43 = vector.multi_reduction <add>, %42, %cst_26 [0] : vector<64x128xf32> to vector<128xf32>
    %44 = vector.shape_cast %43 : vector<128xf32> to vector<1x128xf32>
    %45 = arith.addf %39, %44 : vector<1x128xf32>
    %46 = arith.index_cast %arg2 : i32 to index
    %c0_27 = arith.constant 0 : index
    %c0_28 = arith.constant 0 : index
    %c0_29 = arith.constant 0 : index
    %47 = vector.load %arg10[%46, %c0_27, %c0_28, %c0_29] : memref<2x1x1x128xf32, #tpu.memory_space<vmem>>, vector<1x1x1x128xf32>
    %48 = vector.shape_cast %47 : vector<1x1x1x128xf32> to vector<1x128xf32>
    %49 = vector.shape_cast %45 : vector<1x128xf32> to vector<1x1x1x128xf32>
    tpu.vector_store %arg10[%46, %c0_27, %c0_28, %c0_29], %49 {strides = array<i32>} : memref<2x1x1x128xf32, #tpu.memory_space<vmem>>, vector<1x1x1x128xf32>,
    %50 = arith.index_cast %arg2 : i32 to index
    %c0_30 = arith.constant 0 : index
    %c0_31 = arith.constant 0 : index
    %c0_32 = arith.constant 0 : index
    %51 = vector.load %arg9[%50, %c0_30, %c0_31, %c0_32] : memref<2x1x1x128xf32, #tpu.memory_space<vmem>>, vector<1x1x1x128xf32>
    %52 = vector.shape_cast %51 : vector<1x1x1x128xf32> to vector<1x128xf32>
    %53 = vector.shape_cast %33 : vector<1x128xf32> to vector<1x1x1x128xf32>
    tpu.vector_store %arg9[%50, %c0_30, %c0_31, %c0_32], %53 {strides = array<i32>} : memref<2x1x1x128xf32, #tpu.memory_space<vmem>>, vector<1x1x1x128xf32>,
    %c1_i32 = arith.constant 1 : i32
    %54 = arith.cmpi eq, %arg2, %c1_i32 : i32
    %55 = arith.extui %54 : i1 to i32
    %c0_i32_33 = arith.constant 0 : i32
    %56 = arith.cmpi ne, %55, %c0_i32_33 : i32
    scf.if %56 {
      %c0_34 = arith.constant 0 : index
      %c0_35 = arith.constant 0 : index
      %57 = vector.load %arg13[%c0_34, %c0_35] : memref<64x1xf32, #tpu.memory_space<vmem>>, vector<64x1xf32>
      %c0_36 = arith.constant 0 : index
      %c0_37 = arith.constant 0 : index
      %58 = vector.load %arg14[%c0_36, %c0_37] : memref<64x1xf32, #tpu.memory_space<vmem>>, vector<64x1xf32>
      %59 = math.log %58 : vector<64x1xf32>
      %60 = arith.addf %57, %59 : vector<64x1xf32>
      %c0_38 = arith.constant 0 : index
      %c0_39 = arith.constant 0 : index
      %61 = vector.load %arg12[%c0_38, %c0_39] : memref<64x1xf32, #tpu.memory_space<vmem>>, vector<64x1xf32>
      %cst_40 = arith.constant 2.000000e+00 : f32
      %62 = vector.broadcast %cst_40 : f32 to vector<64x1xf32>
      %63 = arith.mulf %62, %61 : vector<64x1xf32>
      %64 = arith.subf %60, %63 : vector<64x1xf32>
      %65 = vector.shape_cast %64 : vector<64x1xf32> to vector<1x64x1xf32>
      %cst_41 = arith.constant dense<0.000000e+00> : vector<1xf32>
      %66 = vector.multi_reduction <add>, %65, %cst_41 [1, 2] : vector<1x64x1xf32> to vector<1xf32>
      %67 = vector.shape_cast %66 : vector<1xf32> to vector<1x1x1xf32>
      %68 = vector.extract %67[0, 0, 0] : f32 from vector<1x1x1xf32>
      %69 = vector.broadcast %68 : f32 to vector<1x1xf32>
      %c0_42 = arith.constant 0 : index
      %c0_43 = arith.constant 0 : index
      %c0_44 = arith.constant 0 : index
      %70 = vector.load %arg8[%c0_42, %c0_43, %c0_44] : memref<1x1x1xf32, #tpu.memory_space<vmem>>, vector<1x1x1xf32>
      %71 = vector.shape_cast %69 : vector<1x1xf32> to vector<1x1x1xf32>
      %72 = arith.addf %70, %71 : vector<1x1x1xf32>
      %c0_45 = arith.constant 0 : index
      %c0_46 = arith.constant 0 : index
      %c0_47 = arith.constant 0 : index
      %73 = vector.load %arg8[%c0_45, %c0_46, %c0_47] : memref<1x1x1xf32, #tpu.memory_space<vmem>>, vector<1x1x1xf32>
      tpu.vector_store %arg8[%c0_45, %c0_46, %c0_47], %72 {strides = array<i32>} : memref<1x1x1xf32, #tpu.memory_space<vmem>>, vector<1x1x1xf32>,
    } else {
    }
    return
  }
  func.func @transform_0(%arg0: i32, %arg1: i32, %arg2: i32) -> (i32, i32) {
    %c2_i32 = arith.constant 2 : i32
    %0 = arith.muli %arg0, %c2_i32 : i32
    %1 = arith.addi %0, %arg1 : i32
    %c0_i32 = arith.constant 0 : i32
    %c0_i32_0 = arith.constant 0 : i32
    return %1, %c0_i32 : i32, i32
  }
  func.func @transform_1(%arg0: i32, %arg1: i32, %arg2: i32) -> (i32, i32) {
    %c2_i32 = arith.constant 2 : i32
    %0 = arith.muli %arg0, %c2_i32 : i32
    %1 = arith.addi %0, %arg1 : i32
    %c0_i32 = arith.constant 0 : i32
    %c0_i32_0 = arith.constant 0 : i32
    return %1, %c0_i32 : i32, i32
  }
  func.func @transform_2(%arg0: i32, %arg1: i32, %arg2: i32) -> (i32, i32) {
    %c0_i32 = arith.constant 0 : i32
    %c0_i32_0 = arith.constant 0 : i32
    return %c0_i32, %arg2 : i32, i32
  }
  func.func @transform_3(%arg0: i32, %arg1: i32, %arg2: i32) -> (i32, i32) {
    %c0_i32 = arith.constant 0 : i32
    %c0_i32_0 = arith.constant 0 : i32
    %c0_i32_1 = arith.constant 0 : i32
    return %c0_i32, %c0_i32_0 : i32, i32
  }
  func.func @transform_4(%arg0: i32, %arg1: i32, %arg2: i32) -> (i32, i32) {
    %c0_i32 = arith.constant 0 : i32
    %c0_i32_0 = arith.constant 0 : i32
    %c0_i32_1 = arith.constant 0 : i32
    return %c0_i32, %c0_i32_0 : i32, i32
  }
  func.func @transform_5(%arg0: i32, %arg1: i32, %arg2: i32) -> (i32, i32, i32) {
    %c0_i32 = arith.constant 0 : i32
    %c0_i32_0 = arith.constant 0 : i32
    %c0_i32_1 = arith.constant 0 : i32
    return %arg0, %c0_i32, %c0_i32_0 : i32, i32, i32
  }
  func.func @transform_6(%arg0: i32, %arg1: i32, %arg2: i32) -> (i32, i32, i32, i32) {
    %c0_i32 = arith.constant 0 : i32
    %c0_i32_0 = arith.constant 0 : i32
    %c0_i32_1 = arith.constant 0 : i32
    %c0_i32_2 = arith.constant 0 : i32
    return %c0_i32, %arg0, %c0_i32_0, %c0_i32_1 : i32, i32, i32, i32
  }
  func.func @transform_7(%arg0: i32, %arg1: i32, %arg2: i32) -> (i32, i32, i32, i32) {
    %c0_i32 = arith.constant 0 : i32
    %c0_i32_0 = arith.constant 0 : i32
    %c0_i32_1 = arith.constant 0 : i32
    %c0_i32_2 = arith.constant 0 : i32
    return %c0_i32, %arg0, %c0_i32_0, %c0_i32_1 : i32, i32, i32, i32
  }
}

</mosaic_0001>

<bundles_post_ra>
// kernel: va_nce_loss.2
= control target key start
LH: loop header
LB: loop body
LE: loop exit
PB: predicated region body
PF: predicated region fallthrough
CT: control target
= control target key end

     0   :  { %s923_s12 = smov 0   ;;  %s1041_s0 = inlined_call_operand.vmem [shape: bf16[256,256], index: 0, kind: input, shape index: {}]   ;;  %s1042_s1 = inlined_call_operand.vmem [shape: bf16[256,128], index: 1, kind: input, shape index: {}]   ;;  %s1043_s2 = inlined_call_operand.vmem [shape: f32[1,128], index: 2, kind: input, shape index: {}]   ;;  %s1044_s3 = inlined_call_operand.vmem [shape: bf16[256,128], index: 3, kind: output, shape index: {}]  }
   0x1 LB: > { %s642_s13 = sadd.s32 4294967295, %s901_s12   ;;  %p646_p0 = scmp.ge.s32.totalorder %s901_s12, 1  ;;  %s901_s12 = sphi %s923_s12, %s13_s12  }
   0x2   : > { %p139_p1 = scmp.lt.s32.totalorder %s901_s12, 3 }
   0x4   : > { %p140_p2 = pnand %p646_p0, %p139_p1 }
   0x5   : > { %s647_s16 = sshll.u32 (!%p140_p2), %s642_s13, 4 }
   0x6   : > { %143 = sbr.rel (%p140_p2) target bundleno = 274 (0x112), region = 32  ;;  %p165_p3 = scmp.lt.s32.totalorder (!%p140_p2), %s647_s16, 31 }
   0xb   : > { %v855_v0 = vld [vmem:[%s1042_s1 + $0x78] sm:$0xff]   ;;  %v857_v2 = vld [vmem:[%s1042_s1 + $0x70] sm:$0xff]   ;;  %v859_v4 = vld [vmem:[%s1042_s1 + $0x68] sm:$0xff]   ;;  %s1046_s16 = smov (!%p165_p3, %s647_s16), 31 }
   0xc   : > { %v856_v1 = vld [vmem:[%s1042_s1 + $0x38] sm:$0xff]   ;;  %767 = vmatprep.subr.bf16.mxu0 %v855_v0  ;;  %831 = vmatprep.subr.bf16.mxu1 %v855_v0  ;;  %v858_v3 = vld [vmem:[%s1042_s1 + $0x30] sm:$0xff]   ;;  %v860_v5 = vld [vmem:[%s1042_s1 + $0x28] sm:$0xff]   ;;  %s703_s4 = sshll.u32 %s1046_s16, 3  ;;  %s651_s28 = sshll.u32 %s1046_s16, 2 }
   0xd   : > { %768 = vmatpush3.bf16.msra.mxu0 %v856_v1  ;;  %839 = vmatpush3.bf16.msra.mxu1 %v856_v1  ;;  %v861_v6 = vld [vmem:[%s1042_s1 + $0x60] sm:$0xff]   ;;  %v863_v8 = vld [vmem:[%s1042_s1 + $0x58] sm:$0xff]   ;;  %s964_s9 = scalar_lea.vmem %s1041_s0, %s703_s4  ;;  %v865_v10 = vld [vmem:[%s1042_s1 + $0x50] sm:$0xff]   ;;  %s1016_s4 = scalar_lea.vmem %s1044_s3, %s651_s28 }
   0xe   : > { %769 = vmatprep.subr.bf16.mxu0 %v857_v2  ;;  %832 = vmatprep.subr.bf16.mxu1 %v857_v2  ;;  %v862_v7 = vld [vmem:[%s1042_s1 + $0x20] sm:$0xff]   ;;  %v864_v9 = vld [vmem:[%s1042_s1 + $0x18] sm:$0xff]   ;;  %v866_v13 = vld [vmem:[%s1042_s1 + $0x10] sm:$0xff]  }
   0xf   : > { %v873_v11 = vld [vmem:[%s964_s9 + $0x4] ss:$8 sps:$4 sm:$0xff]   ;;  %v871_v18 = vld [vmem:[%s964_s9] ss:$8 sps:$4 sm:$0xff]   ;;  %v877_v20 = vld [vmem:[%s964_s9 + $0x14] ss:$8 sps:$4 sm:$0xff]  }
  0x10   : > { %v876_v12 = vld [vmem:[%s964_s9 + $0x44] ss:$8 sps:$4 sm:$0xff]   ;;  %441 = vmatprep.mubr.bf16.mxu0 %v873_v11  ;;  %v874_v19 = vld [vmem:[%s964_s9 + $0x40] ss:$8 sps:$4 sm:$0xff]   ;;  %v879_v21 = vld [vmem:[%s964_s9 + $0x54] ss:$8 sps:$4 sm:$0xff]  }
  0x11   : > { %770 = vmatpush3.bf16.msra.mxu0 %v858_v3  ;;  %840 = vmatpush3.bf16.msra.mxu1 %v858_v3  ;;  %v867_v14 = vld [vmem:[%s1042_s1 + $0x48] sm:$0xff]   ;;  %v869_v16 = vld [vmem:[%s1042_s1 + $0x40] sm:$0xff]   ;;  %v881_v22 = vld [vmem:[%s964_s9 + $0x10] ss:$8 sps:$4 sm:$0xff]  }
  0x12   : > { %771 = vmatprep.subr.bf16.mxu0 %v859_v4  ;;  %833 = vmatprep.subr.bf16.mxu1 %v859_v4  ;;  %v868_v15 = vld [vmem:[%s1042_s1 + $0x8] sm:$0xff]   ;;  %v870_v17 = vld [vmem:[%s1042_s1] sm:$0xff]   ;;  %v882_v23 = vld [vmem:[%s964_s9 + $0x50] ss:$8 sps:$4 sm:$0xff]  }
  0x13   : > { %473 = vmatprep.mubr.bf16.mxu1 %v876_v12  ;;  %v883_v24 = vld [vmem:[%s964_s9 + $0x24] ss:$8 sps:$4 sm:$0xff]   ;;  %v887_v26 = vld [vmem:[%s964_s9 + $0x20] ss:$8 sps:$4 sm:$0xff]   ;;  %v889_v28 = vld [vmem:[%s964_s9 + $0x34] ss:$8 sps:$4 sm:$0xff]  }
  0x14   : > { %v885_v25 = vld [vmem:[%s964_s9 + $0x64] ss:$8 sps:$4 sm:$0xff]   ;;  %v888_v27 = vld [vmem:[%s964_s9 + $0x60] ss:$8 sps:$4 sm:$0xff]   ;;  %v891_v29 = vld [vmem:[%s964_s9 + $0x74] ss:$8 sps:$4 sm:$0xff]  }
  0x15   : > { %772 = vmatpush3.bf16.msra.mxu0 %v860_v5  ;;  %841 = vmatpush3.bf16.msra.mxu1 %v860_v5  ;;  %v893_v30 = vld [vmem:[%s964_s9 + $0x30] ss:$8 sps:$4 sm:$0xff]   ;;  %v1006_v40 = vld [vmem:[%s1043_s2] ss:$0 sm:$0xff] }
  0x16   : > { %773 = vmatprep.subr.bf16.mxu0 %v861_v6  ;;  %834 = vmatprep.subr.bf16.mxu1 %v861_v6  ;;  %v894_v31 = vld [vmem:[%s964_s9 + $0x70] ss:$8 sps:$4 sm:$0xff]  }
  0x19   : > { %774 = vmatpush3.bf16.msra.mxu0 %v862_v7  ;;  %842 = vmatpush3.bf16.msra.mxu1 %v862_v7 }
  0x1a   : > { %775 = vmatprep.subr.bf16.mxu0 %v863_v8  ;;  %835 = vmatprep.subr.bf16.mxu1 %v863_v8 }
  0x1d   : > { %776 = vmatpush3.bf16.msra.mxu0 %v864_v9  ;;  %843 = vmatpush3.bf16.msra.mxu1 %v864_v9 }
  0x1e   : > { %777 = vmatprep.subr.bf16.mxu0 %v865_v10  ;;  %836 = vmatprep.subr.bf16.mxu1 %v865_v10 }
  0x21   : > { %778 = vmatpush3.bf16.msra.mxu0 %v866_v13  ;;  %844 = vmatpush3.bf16.msra.mxu1 %v866_v13 }
  0x22   : > { %779 = vmatprep.subr.bf16.mxu0 %v867_v14  ;;  %837 = vmatprep.subr.bf16.mxu1 %v867_v14 }
  0x25   : > { %780 = vmatpush3.bf16.msra.mxu0 %v868_v15  ;;  %845 = vmatpush3.bf16.msra.mxu1 %v868_v15 }
  0x26   : > { %781 = vmatprep.subr.bf16.mxu0 %v869_v16  ;;  %838 = vmatprep.subr.bf16.mxu1 %v869_v16 }
  0x29   : > { %782 = vmatpush3.bf16.msra.mxu0 %v870_v17  ;;  %846 = vmatpush3.bf16.msra.mxu1 %v870_v17 }
  0x2c   : > { %442 = vmatmul.mubr.bf16.vlgmr.msra.gmra.mxu0 %v871_v18  ;;  %474 = vmatmul.mubr.bf16.vlgmr.msra.gmra.mxu1 %v874_v19 }
  0x2d   : > { %449 = vmatprep.mubr.bf16.mxu0 %v877_v20  ;;  %481 = vmatprep.mubr.bf16.mxu1 %v879_v21 }
  0x34   : > { %450 = vmatmul.mubr.bf16.gmra.mxu0 %v881_v22  ;;  %482 = vmatmul.mubr.bf16.gmra.mxu1 %v882_v23 }
  0x35   : > { %457 = vmatprep.mubr.bf16.mxu0 %v883_v24  ;;  %489 = vmatprep.mubr.bf16.mxu1 %v885_v25 }
  0x3c   : > { %458 = vmatmul.mubr.bf16.gmra.mxu0 %v887_v26  ;;  %490 = vmatmul.mubr.bf16.gmra.mxu1 %v888_v27 }
  0x3d   : > { %465 = vmatprep.mubr.bf16.mxu0 %v889_v28  ;;  %497 = vmatprep.mubr.bf16.mxu1 %v891_v29 }
  0x44   : > { %466 = vmatmul.mubr.bf16.gmra.mxu0 %v893_v30  ;;  %498 = vmatmul.mubr.bf16.gmra.mxu1 %v894_v31 }
  0xec   : > { %v783_v32 = vpop.f32.mrf.mxu0  ;;  %v807_v33 = vpop.f32.mrf.mxu1 }
  0xee   : > { %v784_v34 = vpop.f32.mrf.mxu0  ;;  %v808_v35 = vpop.f32.mrf.mxu1 }
  0xef   : > { %v785_v38 = vadd.f32 %v784_v34, %v783_v32  ;;  %v809_v39 = vadd.f32 %v808_v35, %v807_v33 }
  0xf0   : > { %v786_v36 = vpop.f32.mrf.mxu0  ;;  %v810_v37 = vpop.f32.mrf.mxu1 }
  0xf1   : > { %v444_v47 = vadd.f32 %v785_v38, %v1006_v40  ;;  %v476_v48 = vadd.f32 %v809_v39, %v1006_v40 }
  0xf2   : > { %v787_v41 = vpop.f32.mrf.mxu0  ;;  %v811_v42 = vpop.f32.mrf.mxu1 }
  0xf3   : > { %v788_v43 = vadd.f32 %v787_v41, %v786_v36  ;;  %v812_v44 = vadd.f32 %v811_v42, %v810_v37 }
  0xf4   : > { %v789_v45 = vpop.f32.mrf.mxu0  ;;  %v813_v46 = vpop.f32.mrf.mxu1 }
  0xf5   : > { %v447_v49 = vadd.f32 %v788_v43, %v1006_v40  ;;  %v479_v50 = vadd.f32 %v812_v44, %v1006_v40 }
  0xf6   : > { %v790_v51 = vpop.f32.mrf.mxu0  ;;  %v814_v52 = vpop.f32.mrf.mxu1 }
  0xf7   : > { %v723_v53 = vpack.c.bf16 %v447_v49, %v444_v47  ;;  %v743_v54 = vpack.c.bf16 %v479_v50, %v476_v48  ;;  %v791_v57 = vadd.f32 %v790_v51, %v789_v45  ;;  %v815_v58 = vadd.f32 %v814_v52, %v813_v46 }
  0xf8   : > { %v792_v55 = vpop.f32.mrf.mxu0  ;;  %v816_v56 = vpop.f32.mrf.mxu1 }
  0xf9   : > { %724 = vst [vmem:[%s1016_s4] sm:$0xff] %v723_v53   ;;  %763 = vst [vmem:[%s1016_s4 + $0x20] sm:$0xff] %v743_v54   ;;  %v452_v1 = vadd.f32 %v791_v57, %v1006_v40  ;;  %v484_v2 = vadd.f32 %v815_v58, %v1006_v40 }
  0xfa   : > { %v793_v59 = vpop.f32.mrf.mxu0  ;;  %v817_v60 = vpop.f32.mrf.mxu1 }
  0xfb   : > { %v794_v61 = vadd.f32 %v793_v59, %v792_v55  ;;  %v818_v62 = vadd.f32 %v817_v60, %v816_v56 }
  0xfc   : > { %v795_v63 = vpop.f32.mrf.mxu0  ;;  %v819_v0 = vpop.f32.mrf.mxu1 }
  0xfd   : > { %v455_v3 = vadd.f32 %v794_v61, %v1006_v40  ;;  %v487_v4 = vadd.f32 %v818_v62, %v1006_v40 }
  0xfe   : > { %v796_v5 = vpop.f32.mrf.mxu0  ;;  %v820_v6 = vpop.f32.mrf.mxu1 }
  0xff   : > { %v728_v7 = vpack.c.bf16 %v455_v3, %v452_v1  ;;  %v748_v8 = vpack.c.bf16 %v487_v4, %v484_v2  ;;  %v797_v11 = vadd.f32 %v796_v5, %v795_v63  ;;  %v821_v12 = vadd.f32 %v820_v6, %v819_v0 }
 0x100   : > { %v798_v9 = vpop.f32.mrf.mxu0  ;;  %v822_v10 = vpop.f32.mrf.mxu1 }
 0x101   : > { %760 = vst [vmem:[%s1016_s4 + $0x8] sm:$0xff] %v728_v7   ;;  %764 = vst [vmem:[%s1016_s4 + $0x28] sm:$0xff] %v748_v8   ;;  %v460_v19 = vadd.f32 %v797_v11, %v1006_v40  ;;  %v492_v20 = vadd.f32 %v821_v12, %v1006_v40 }
 0x102   : > { %v799_v13 = vpop.f32.mrf.mxu0  ;;  %v823_v14 = vpop.f32.mrf.mxu1 }
 0x103   : > { %v800_v15 = vadd.f32 %v799_v13, %v798_v9  ;;  %v824_v16 = vadd.f32 %v823_v14, %v822_v10 }
 0x104   : > { %v801_v17 = vpop.f32.mrf.mxu0  ;;  %v825_v18 = vpop.f32.mrf.mxu1 }
 0x105   : > { %v463_v21 = vadd.f32 %v800_v15, %v1006_v40  ;;  %v495_v22 = vadd.f32 %v824_v16, %v1006_v40 }
 0x106   : > { %v802_v23 = vpop.f32.mrf.mxu0  ;;  %v826_v24 = vpop.f32.mrf.mxu1 }
 0x107   : > { %v733_v25 = vpack.c.bf16 %v463_v21, %v460_v19  ;;  %v753_v26 = vpack.c.bf16 %v495_v22, %v492_v20  ;;  %v803_v29 = vadd.f32 %v802_v23, %v801_v17  ;;  %v827_v30 = vadd.f32 %v826_v24, %v825_v18 }
 0x108   : > { %v804_v27 = vpop.f32.mrf.mxu0  ;;  %v828_v28 = vpop.f32.mrf.mxu1 }
 0x109   : > { %761 = vst [vmem:[%s1016_s4 + $0x10] sm:$0xff] %v733_v25   ;;  %765 = vst [vmem:[%s1016_s4 + $0x30] sm:$0xff] %v753_v26   ;;  %v468_v35 = vadd.f32 %v803_v29, %v1006_v40  ;;  %v500_v36 = vadd.f32 %v827_v30, %v1006_v40 }
 0x10a   : > { %v805_v31 = vpop.f32.mrf.mxu0  ;;  %v829_v32 = vpop.f32.mrf.mxu1 }
 0x10b   : > { %v806_v33 = vadd.f32 %v805_v31, %v804_v27  ;;  %v830_v34 = vadd.f32 %v829_v32, %v828_v28 }
 0x10d   : > { %v471_v37 = vadd.f32 %v806_v33, %v1006_v40  ;;  %v503_v38 = vadd.f32 %v830_v34, %v1006_v40 }
 0x10f   : > { %v738_v39 = vpack.c.bf16 %v471_v37, %v468_v35  ;;  %v758_v41 = vpack.c.bf16 %v503_v38, %v500_v36 }
 0x111   : > { %762 = vst [vmem:[%s1016_s4 + $0x18] sm:$0xff] %v738_v39   ;;  %766 = vst [vmem:[%s1016_s4 + $0x38] sm:$0xff] %v758_v41  }
 0x112 PF: > { %s13_s12 = sadd.s32 1, %s901_s12  }
 0x113   : > { %p10_p4 = scmp.ge.s32.totalorder %s13_s12, 4  }
 0x115   :  { %12 = sbr.rel (!%p10_p4) target bundleno = 1 (0x1), region = 62 }

// kernel: va_nce_loss.3
= control target key start
LH: loop header
LB: loop body
LE: loop exit
PB: predicated region body
PF: predicated region fallthrough
CT: control target
= control target key end

     0   :  { %s2496_s0 = inlined_call_operand.vmem [shape: bf16[256,128], index: 0, kind: input, shape index: {}]   ;;  %s2497_s1 = inlined_call_operand.vmem [shape: bf16[256,128], index: 1, kind: input, shape index: {}]   ;;  %s2498_s2 = inlined_call_operand.vmem [shape: bf16[128,256], index: 2, kind: input, shape index: {}]   ;;  %s2499_s3 = inlined_call_operand.vmem [shape: bf16[128,128], index: 3, kind: input, shape index: {}]   ;;  %s2500_s4 = inlined_call_operand.vmem [shape: f32[1,128], index: 4, kind: input, shape index: {}]   ;;  %s2501_s5 = inlined_call_operand.vmem [shape: f32[2,1,1], index: 5, kind: output, shape index: {0}]   ;;  %s2502_s6 = inlined_call_operand.vmem [shape: f32[2,2,1,128], index: 6, kind: output, shape index: {1}]   ;;  %s2503_s7 = inlined_call_operand.vmem [shape: f32[2,2,1,128], index: 7, kind: output, shape index: {2}]  }
   0x1   :  { %2509 = sst [smem:[#allocation16_spill]] %s2498_s2 }
   0x2   :  { %s2056_s24 = smov 0   ;;  %s2058_s25 = smov 0  }
   0x3   :  { %s2060_s26 = smov 0   ;;  %s2062_s27 = smov 0  }
   0x4   :  { %s2064_s28 = smov 0   ;;  %s2066_s29 = smov 0  }
   0x5   :  { %s2068_s30 = smov 0   ;;  %s2070_s8 = smov 0  }
   0x6   :  { %s2072_s9 = smov 0   ;;  %s2074_s10 = smov 0  }
   0x7   :  { %s2076_s11 = smov 0  }
   0x8 LB: > { %2510 = sst [smem:[#allocation9_spill]] %s1997_s8  ;;  %s30_s12 = sadd.s32 1, %s1997_s8  ;;  %s2009_s11 = sphi %s2076_s11, %s18_s11   ;;  %s2005_s10 = sphi %s2074_s10, %s2525_s10   ;;  %s2001_s9 = sphi %s2072_s9, %s2524_s9   ;;  %s1997_s8 = sphi %s2070_s8, %s2530_s8   ;;  %s1993_s30 = sphi %s2068_s30, %s2522_s30   ;;  %s1989_s29 = sphi %s2066_s29, %s2521_s29   ;;  %s1985_s28 = sphi %s2064_s28, %s2520_s28   ;;  %s1981_s27 = sphi %s2062_s27, %s2529_s27   ;;  %s1977_s26 = sphi %s2060_s26, %s2528_s26   ;;  %s1973_s25 = sphi %s2058_s25, %s2527_s25   ;;  %s1969_s24 = sphi %s2056_s24, %s2526_s24  }
   0x9   : > { %2511 = sst [smem:[#allocation10_spill]] %s2001_s9  ;;  %p31_p0 = scmp.ge.s32.totalorder %s30_s12, 2 }
   0xa   : > { %2512 = sst [smem:[#allocation11_spill]] %s2005_s10  ;;  %s33_s13 = sadd.s32 1, %s2001_s9 }
   0xb   : > { %s1523_s14 = sadd.s32 4294967295, %s2009_s11   ;;  %s37_s15 = sadd.s32 1, %s2005_s10 }
   0xc   : > { %s2532_s12 = smov (%p31_p0, %s30_s12), 0  ;;  %s2534_s13 = smov (!%p31_p0, %s33_s13), %s2001_s9 }
   0xd   : > { %2513 = sst [smem:[#allocation12_spill]] %s2532_s12  ;;  %s101_s16 = ssub.s32 %s1997_s8, %s2532_s12 }
   0xe   : > { %s104_s17 = sadd.s32 1, %s1981_s27  ;;  %p35_p1 = scmp.ge.s32.totalorder %s2534_s13, 2 }
   0xf   : > { %p102_p2 = scmp.eq.s32.totalorder %s101_s16, 0  ;;  %p111_p3 = scmp.ne.s32.totalorder %s1981_s27, %s1977_s26 }
  0x10   : > { %p112_p4 = scmp.eq.s32.totalorder %s2009_s11, 0  ;;  %s2536_s13 = smov (%p35_p1, %s2534_s13), 0 }
  0x11   : > { %2514 = sst [smem:[#allocation13_spill]] %s2536_s13  ;;  %s2538_s15 = smov (!%p35_p1, %s37_s15), %s2005_s10 }
  0x12   : > { %s2128_s18 = scalar_select %p102_p2, %s1981_s27, %s104_s17  }
  0x13   : > { %p39_p5 = scmp.ge.s32.totalorder %s2538_s15, 2  ;;  %p113_p6 = por %p112_p4, %p111_p3 }
  0x14   : > { %2515 = sst [smem:[#allocation14_spill]] %s2128_s18  ;;  %p208_p7 = scmp.ne.s32.totalorder %s1973_s25, %s1969_s24 }
  0x15   : > { %p209_p8 = scmp.eq.s32.totalorder %s1523_s14, 7  ;;  %s2540_s15 = smov (%p39_p5, %s2538_s15), 0 }
  0x16   : > { %2516 = sst [smem:[#allocation15_spill]] %s2540_s15  ;;  %s195_s20 = ssub.s32 %s2005_s10, %s2540_s15 }
  0x17   : > { %p2134_p9 = por %p209_p8, %p208_p7  ;;  %s198_s21 = sadd.s32 1, %s1973_s25 }
  0x18   : > { %p196_p10 = scmp.eq.s32.totalorder %s195_s20, 0  ;;  %p1530_p11 = scmp.ge.s32.totalorder %s2009_s11, 8 }
  0x1a   : > { %s2142_s22 = scalar_select %p196_p10, %s1973_s25, %s198_s21  }
  0x1b   : > { %263 = sbr.rel (%p1530_p11) target bundleno = 52 (0x34), region = 24 }
  0x20   : > { %292 = sbr.rel (!%p113_p6) target bundleno = 52 (0x34), region = 36  ;;  %s294_s23 = sand.u32 (%p113_p6), 1, %s1981_s27  }
  0x21   : > { %s1532_s14 = sshll.u32 (%p113_p6), %s1997_s8, 2  ;;  %s1531_s16 = sshll.u32 (%p113_p6), %s294_s23, 6 }
  0x22   : > { %s2518_s2 = sld [smem:[#allocation16_spill]] (%p113_p6)  ;;  %s296_s20 = scalar_lea.vmem (%p113_p6), [#allocation6], %s1531_s16 }
  0x28   : > { %s2150_s12 = scalar_lea.vmem %s2518_s2, %s1532_s14 }
  0x29   : > { %v315_v0 = vld [vmem:[%s2150_s12] sm:$0xf]  ;;  %v317_v1 = vld [vmem:[%s2150_s12 + $0x8] sm:$0xf]  ;;  %v319_v2 = vld [vmem:[%s2150_s12 + $0x10] sm:$0xf] }
  0x2a   : > { %316 = vst [vmem:[%s296_s20] sm:$0xf] %v315_v0  ;;  %318 = vst [vmem:[%s296_s20 + $0x4] sm:$0xf] %v317_v1  ;;  %v321_v3 = vld [vmem:[%s2150_s12 + $0x18] sm:$0xf] }
  0x2b   : > { %v323_v4 = vld [vmem:[%s2150_s12 + $0x20] sm:$0xf]  ;;  %320 = vst [vmem:[%s296_s20 + $0x8] sm:$0xf] %v319_v2  ;;  %322 = vst [vmem:[%s296_s20 + $0xc] sm:$0xf] %v321_v3 }
  0x2c   : > { %324 = vst [vmem:[%s296_s20 + $0x10] sm:$0xf] %v323_v4  ;;  %v325_v5 = vld [vmem:[%s2150_s12 + $0x28] sm:$0xf]  ;;  %v327_v6 = vld [vmem:[%s2150_s12 + $0x30] sm:$0xf] }
  0x2d   : > { %v329_v7 = vld [vmem:[%s2150_s12 + $0x38] sm:$0xf]  ;;  %326 = vst [vmem:[%s296_s20 + $0x14] sm:$0xf] %v325_v5  ;;  %328 = vst [vmem:[%s296_s20 + $0x18] sm:$0xf] %v327_v6 }
  0x2e   : > { %330 = vst [vmem:[%s296_s20 + $0x1c] sm:$0xf] %v329_v7  ;;  %v331_v8 = vld [vmem:[%s2150_s12 + $0x40] sm:$0xf]  ;;  %v333_v9 = vld [vmem:[%s2150_s12 + $0x48] sm:$0xf] }
  0x2f   : > { %v335_v10 = vld [vmem:[%s2150_s12 + $0x50] sm:$0xf]  ;;  %332 = vst [vmem:[%s296_s20 + $0x20] sm:$0xf] %v331_v8  ;;  %334 = vst [vmem:[%s296_s20 + $0x24] sm:$0xf] %v333_v9 }
  0x30   : > { %336 = vst [vmem:[%s296_s20 + $0x28] sm:$0xf] %v335_v10  ;;  %v337_v11 = vld [vmem:[%s2150_s12 + $0x58] sm:$0xf]  ;;  %v339_v12 = vld [vmem:[%s2150_s12 + $0x60] sm:$0xf] }
  0x31   : > { %v341_v13 = vld [vmem:[%s2150_s12 + $0x68] sm:$0xf]  ;;  %338 = vst [vmem:[%s296_s20 + $0x2c] sm:$0xf] %v337_v11  ;;  %340 = vst [vmem:[%s296_s20 + $0x30] sm:$0xf] %v339_v12 }
  0x32   : > { %342 = vst [vmem:[%s296_s20 + $0x34] sm:$0xf] %v341_v13  ;;  %v343_v14 = vld [vmem:[%s2150_s12 + $0x70] sm:$0xf]  ;;  %v345_v15 = vld [vmem:[%s2150_s12 + $0x78] sm:$0xf] }
  0x33   : > { %344 = vst [vmem:[%s296_s20 + $0x38] sm:$0xf] %v343_v14  ;;  %346 = vst [vmem:[%s296_s20 + $0x3c] sm:$0xf] %v345_v15 }
  0x34 PF: > { %p1533_p12 = scmp.ge.s32.totalorder %s2009_s11, 1  ;;  %p401_p13 = scmp.lt.s32.totalorder %s2009_s11, 9 }
  0x36   : > { %p402_p0 = pnand %p1533_p12, %p401_p13 }
  0x37   : > { %s408_s13 = sand.u32 (!%p402_p0), 1, %s1977_s26   ;;  %s450_s12 = sand.u32 (!%p402_p0), 1, %s1969_s24  }
  0x38   : > { %405 = sbr.rel (%p402_p0) target bundleno = 1402 (0x57a), region = 77  ;;  %s1534_s21 = sshll.u32 (!%p402_p0), %s408_s13, 6 }
  0x39   : > { %s1535_s23 = sshll.u32 (!%p402_p0), %s450_s12, 1  ;;  %s1537_s14 = sshll.u32 (!%p402_p0), %s1993_s30, 1 }
  0x3a   : > { %s460_s16 = sadd.s32 (!%p402_p0), %s1989_s29, %s1537_s14  ;;  %p479_p1 = scmp.lt.s32.totalorder (!%p402_p0), %s1993_s30, 1 }
  0x3b   : > { %s1538_s17 = sshll.u32 (!%p402_p0), %s460_s16, 3  ;;  %p483_p2 = scmp.eq.s32.totalorder (!%p402_p0), %s1989_s29, 0 }
  0x3c   : > { %p462_p3 = scmp.lt.s32.totalorder (!%p402_p0), %s1538_s17, 31  ;;  %p484_p4 = scmp.eq.s32.totalorder (!%p402_p0), %s1985_s28, 0 }
  0x3d   : > { %s480_s20 = scalar_select %p479_p1, %s1993_s30, 1 }
  0x3e   : > { %s2542_s17 = smov (!%p462_p3, %s1538_s17), 31  ;;  %p485_p5 = pnand %p484_p4, %p483_p2 }
  0x3f   : > { %s2181_s10 = scalar_lea.vmem %s2501_s5, %s480_s20  ;;  %s1539_s9 = sshll.u32 %s2542_s17, 2 }
  0x40   : > { %s2186_s13 = scalar_lea.vmem %s2496_s0, %s1539_s9  ;;  %s2191_s29 = scalar_lea.vmem %s2497_s1, %s1539_s9 }
  0x41   : > { %s2193_s16 = scalar_lea.vmem [#allocation6], %s1534_s21  ;;  %s2195_s8 = scalar_lea.vmem [#allocation7], %s1535_s23 }
  0x42   : > { %s2197_s18 = scalar_lea.vmem [#allocation8], %s1535_s23  ;;  %488 = sbr.rel (%p485_p5) target bundleno = 75 (0x4b), region = 85 }
  0x47   : > { %vm489_vm0 = vcmask 0   ;;  %v2011_v16 = vmov 0.0   ;;  %v2012_v17 = vmov -inf  }
  0x48   : > { %490 = vst.msk [vmem:[%s2181_s10] sm:$0x1] %vm489_vm0, %v2011_v16  ;;  %493 = vst [vmem:[%s2197_s18] sm:$0x1] %v2011_v16 }
  0x49   : > { %494 = vst [vmem:[%s2197_s18 + $0x1] sm:$0x1] %v2011_v16  ;;  %491 = vst [vmem:[%s2195_s8] sm:$0x1] %v2012_v17 }
  0x4a   : > { %492 = vst [vmem:[%s2195_s8 + $0x1] sm:$0x1] %v2012_v17 }
  0x4b PF: > { %p1543_p6 = scmp.ne.s32.totalorder %s1985_s28, 0 }
  0x4d   : > { %497 = sbr.rel (%p1543_p6) target bundleno = 468 (0x1d4), region = 89 }
  0x52   : > { %v1831_v18 = vld [vmem:[%s2499_s3 + $0x38] sm:$0xff]   ;;  %v1832_v19 = vld [vmem:[%s2499_s3 + $0x30] sm:$0xff]   ;;  %v1833_v20 = vld [vmem:[%s2499_s3 + $0x28] sm:$0xff]   ;;  %vm714_vm1 = vcmask 7168   ;;  %v2013_v30 = vmov -inf   ;;  %v2014_v31 = vmov 0.0  }
  0x53   : > { %1656 = vmatprep.subr.bf16.mxu0 %v1831_v18  ;;  %1704 = vmatprep.subr.bf16.mxu1 %v1831_v18  ;;  %v1834_v21 = vld [vmem:[%s2499_s3 + $0x20] sm:$0xff]   ;;  %v1840_v23 = vld [vmem:[%s2186_s13 + $0x10] sm:$0xff]   ;;  %v1835_v24 = vld [vmem:[%s2499_s3 + $0x18] sm:$0xff]   ;;  %763 = vst.msk [vmem:[#allocation4] sm:$0xff] %vm714_vm1, %v2013_v30 }
  0x54   : > { %1657 = vmatpush3.bf16.msra.mxu0 %v1831_v18  ;;  %1712 = vmatpush3.bf16.msra.mxu1 %v1831_v18  ;;  %v1839_v22 = vld [vmem:[%s2186_s13] sm:$0xff]   ;;  %v1836_v25 = vld [vmem:[%s2499_s3 + $0x10] sm:$0xff]   ;;  %v1837_v26 = vld [vmem:[%s2499_s3 + $0x8] sm:$0xff]   ;;  %764 = vst.msk [vmem:[#allocation4 + $0x8] sm:$0xff] %vm714_vm1, %v2013_v30 }
  0x55   : > { %1658 = vmatprep.subr.bf16.mxu0 %v1832_v19  ;;  %1705 = vmatprep.subr.bf16.mxu1 %v1832_v19  ;;  %v1838_v27 = vld [vmem:[%s2499_s3] sm:$0xff]   ;;  %v1841_v28 = vld [vmem:[%s2186_s13 + $0x8] sm:$0xff]   ;;  %v1842_v29 = vld [vmem:[%s2186_s13 + $0x18] sm:$0xff]   ;;  %765 = vst.msk [vmem:[#allocation4 + $0x10] sm:$0xff] %vm714_vm1, %v2013_v30 }
  0x56   : > { %1672 = vmatprep.mubr.bf16.mxu0 %v1839_v22  ;;  %1676 = vmatprep.mubr.bf16.mxu1 %v1840_v23  ;;  %766 = vst.msk [vmem:[#allocation4 + $0x18] sm:$0xff] %vm714_vm1, %v2013_v30  ;;  %767 = vst.msk [vmem:[#allocation4 + $0x20] sm:$0xff] %vm714_vm1, %v2013_v30  ;;  %v1544_v32 = vld [vmem:[%s2500_s4] ss:$0 sm:$0xff]  ;;  %v1626_v33 = vld [vmem:[%s2191_s29 + $0x8] sm:$0xff]  }
  0x57   : > { %768 = vst.msk [vmem:[#allocation4 + $0x28] sm:$0xff] %vm714_vm1, %v2013_v30  ;;  %769 = vst.msk [vmem:[#allocation4 + $0x30] sm:$0xff] %vm714_vm1, %v2013_v30  ;;  %v1591_v38 = vld [vmem:[%s2191_s29] sm:$0xff]   ;;  %v1596_v41 = vunpack.c.l.bf16 %v1626_v33  ;;  %v1627_v52 = vld [vmem:[%s2191_s29 + $0x10] sm:$0xff]   ;;  %v1597_v56 = vunpack.c.h.bf16 %v1626_v33 }
  0x58   : > { %1659 = vmatpush3.bf16.msra.mxu0 %v1832_v19  ;;  %1713 = vmatpush3.bf16.msra.mxu1 %v1832_v19  ;;  %770 = vst.msk [vmem:[#allocation4 + $0x38] sm:$0xff] %vm714_vm1, %v2013_v30  ;;  %771 = vst.msk [vmem:[#allocation5] sm:$0xff] %vm714_vm1, %v2014_v31  ;;  %v1592_v47 = vunpack.c.l.bf16 %v1591_v38  ;;  %v1600_v63 = vunpack.c.l.bf16 %v1627_v52  ;;  %v1601_v5 = vunpack.c.h.bf16 %v1627_v52  ;;  %v1628_v8 = vld [vmem:[%s2191_s29 + $0x18] sm:$0xff]   ;;  %v1593_v10 = vunpack.c.h.bf16 %v1591_v38 }
  0x59   : > { %1660 = vmatprep.subr.bf16.mxu0 %v1833_v20  ;;  %1706 = vmatprep.subr.bf16.mxu1 %v1833_v20  ;;  %772 = vst.msk [vmem:[#allocation5 + $0x8] sm:$0xff] %vm714_vm1, %v2014_v31  ;;  %773 = vst.msk [vmem:[#allocation5 + $0x10] sm:$0xff] %vm714_vm1, %v2014_v31  ;;  %v1605_v12 = vunpack.c.h.bf16 %v1628_v8  ;;  %v1604_v14 = vunpack.c.l.bf16 %v1628_v8 }
  0x5a   : > { %774 = vst.msk [vmem:[#allocation5 + $0x18] sm:$0xff] %vm714_vm1, %v2014_v31  ;;  %775 = vst.msk [vmem:[#allocation5 + $0x20] sm:$0xff] %vm714_vm1, %v2014_v31 }
  0x5b   : > { %776 = vst.msk [vmem:[#allocation5 + $0x28] sm:$0xff] %vm714_vm1, %v2014_v31  ;;  %777 = vst.msk [vmem:[#allocation5 + $0x30] sm:$0xff] %vm714_vm1, %v2014_v31 }
  0x5c   : > { %1661 = vmatpush3.bf16.msra.mxu0 %v1833_v20  ;;  %1714 = vmatpush3.bf16.msra.mxu1 %v1833_v20  ;;  %778 = vst.msk [vmem:[#allocation5 + $0x38] sm:$0xff] %vm714_vm1, %v2014_v31 }
  0x5d   : > { %1662 = vmatprep.subr.bf16.mxu0 %v1834_v21  ;;  %1707 = vmatprep.subr.bf16.mxu1 %v1834_v21 }
  0x60   : > { %1663 = vmatpush3.bf16.msra.mxu0 %v1834_v21  ;;  %1715 = vmatpush3.bf16.msra.mxu1 %v1834_v21 }
  0x61   : > { %1664 = vmatprep.subr.bf16.mxu0 %v1835_v24  ;;  %1708 = vmatprep.subr.bf16.mxu1 %v1835_v24 }
  0x64   : > { %1665 = vmatpush3.bf16.msra.mxu0 %v1835_v24  ;;  %1716 = vmatpush3.bf16.msra.mxu1 %v1835_v24 }
  0x65   : > { %1666 = vmatprep.subr.bf16.mxu0 %v1836_v25  ;;  %1709 = vmatprep.subr.bf16.mxu1 %v1836_v25 }
  0x68   : > { %1667 = vmatpush3.bf16.msra.mxu0 %v1836_v25  ;;  %1717 = vmatpush3.bf16.msra.mxu1 %v1836_v25 }
  0x69   : > { %1668 = vmatprep.subr.bf16.mxu0 %v1837_v26  ;;  %1710 = vmatprep.subr.bf16.mxu1 %v1837_v26 }
  0x6c   : > { %1669 = vmatpush3.bf16.msra.mxu0 %v1837_v26  ;;  %1718 = vmatpush3.bf16.msra.mxu1 %v1837_v26 }
  0x6d   : > { %1670 = vmatprep.subr.bf16.mxu0 %v1838_v27  ;;  %1711 = vmatprep.subr.bf16.mxu1 %v1838_v27 }
  0x70   : > { %1671 = vmatpush3.bf16.msra.mxu0 %v1838_v27  ;;  %1719 = vmatpush3.bf16.msra.mxu1 %v1838_v27 }
  0x73   : > { %1673 = vmatmul.mubr.bf16.vlgmr.msra.gmra.mxu0 %v1841_v28  ;;  %1677 = vmatmul.mubr.bf16.vlgmr.msra.gmra.mxu1 %v1842_v29 }
 0x133   : > { %v1674_v34 = vpop.f32.mrf.mxu0  ;;  %v1678_v35 = vpop.f32.mrf.mxu1 }
 0x134   : > { %v644_v36 = vadd.f32 %v1674_v34, %v1544_v32  ;;  %v660_v37 = vadd.f32 %v1678_v35, %v1544_v32 }
 0x135   : > { %v635_v39 = vpop.f32.mrf.mxu0  ;;  %v651_v40 = vpop.f32.mrf.mxu1 }
 0x136   : > { %v668_v42 = vmul.f32 10.0, %v644_v36  ;;  %v636_v43 = vadd.f32 %v1544_v32, %v635_v39  ;;  %v652_v44 = vadd.f32 %v1544_v32, %v651_v40  ;;  %v672_v48 = vmul.f32 10.0, %v660_v37 }
 0x137   : > { %v1675_v45 = vpop.f32.mrf.mxu0  ;;  %v1679_v46 = vpop.f32.mrf.mxu1 }
 0x138   : > { %v666_v49 = vmul.f32 10.0, %v636_v43  ;;  %v647_v50 = vadd.f32 %v1675_v45, %v1544_v32  ;;  %v663_v51 = vadd.f32 %v1679_v46, %v1544_v32  ;;  %v692_v55 = vmul.f32 %v1596_v41, %v668_v42 }
 0x139   : > { %v638_v53 = vpop.f32.mrf.mxu0  ;;  %v654_v54 = vpop.f32.mrf.mxu1  ;;  %v670_v61 = vmul.f32 10.0, %v652_v44  ;;  %v696_v16 = vmul.f32 %v1604_v14, %v672_v48 }
 0x13a   : > { %v669_v57 = vmul.f32 10.0, %v647_v50  ;;  %v673_v58 = vmul.f32 10.0, %v663_v51  ;;  %v639_v59 = vadd.f32 %v1544_v32, %v638_v53  ;;  %v655_v60 = vadd.f32 %v1544_v32, %v654_v54  ;;  %702 = vadd.xlane.f32.xlu1 %v692_v55 }
 0x13b   : > { %v690_v62 = vmul.f32 %v1592_v47, %v666_v49  ;;  %v694_v9 = vmul.f32 %v1600_v63, %v670_v61 }
 0x13c   : > { %v1614_v0 = vpack.c.bf16 %v669_v57, %v668_v42  ;;  %v1624_v1 = vpack.c.bf16 %v673_v58, %v672_v48  ;;  %v667_v2 = vmul.f32 10.0, %v639_v59  ;;  %v671_v3 = vmul.f32 10.0, %v655_v60 }
 0x13d   : > { %698 = vadd.xlane.f32.xlu0 %v690_v62  ;;  %v693_v4 = vmul.f32 %v1597_v56, %v669_v57  ;;  %v697_v15 = vmul.f32 %v1605_v12, %v673_v58 }
 0x13e   : > { %1629 = vst [vmem:[#allocation2 + $0x8] sm:$0xff] %v1614_v0   ;;  %1631 = vst [vmem:[#allocation2 + $0x18] sm:$0xff] %v1624_v1   ;;  %v1609_v6 = vpack.c.bf16 %v667_v2, %v666_v49  ;;  %v1619_v7 = vpack.c.bf16 %v671_v3, %v670_v61  ;;  %v695_v11 = vmul.f32 %v1601_v5, %v671_v3 }
 0x13f   : > { %704 = vadd.xlane.f32.xlu1 %v693_v4  ;;  %v691_v13 = vmul.f32 %v1593_v10, %v667_v2 }
 0x140   : > { %1610 = vst [vmem:[#allocation2] sm:$0xff] %v1609_v6   ;;  %1630 = vst [vmem:[#allocation2 + $0x10] sm:$0xff] %v1619_v7  }
 0x141   : > { %706 = vadd.xlane.f32.xlu0 %v694_v9 }
 0x143   : > { %708 = vadd.xlane.f32.xlu1 %v695_v11 }
 0x145   : > { %700 = vadd.xlane.f32.xlu0 %v691_v13 }
 0x147   : > { %712 = vadd.xlane.f32.xlu1 %v697_v15 }
 0x149   : > { %710 = vadd.xlane.f32.xlu0 %v696_v16 }
 0x1c3   : > { %v703_v17 = vpop.xlane.xlu1 %702 }
 0x1c4   : > { %717 = vst.msk [vmem:[#allocation3 + $0x10] sm:$0xff] %vm714_vm1, %v703_v17 }
 0x1c6   : > { %v699_v18 = vpop.xlane.xlu0 %698 }
 0x1c7   : > { %715 = vst.msk [vmem:[#allocation3] sm:$0xff] %vm714_vm1, %v699_v18 }
 0x1c8   : > { %v705_v19 = vpop.xlane.xlu1 %704 }
 0x1c9   : > { %718 = vst.msk [vmem:[#allocation3 + $0x18] sm:$0xff] %vm714_vm1, %v705_v19 }
 0x1ca   : > { %v707_v20 = vpop.xlane.xlu0 %706 }
 0x1cb   : > { %719 = vst.msk [vmem:[#allocation3 + $0x20] sm:$0xff] %vm714_vm1, %v707_v20 }
 0x1cc   : > { %v709_v21 = vpop.xlane.xlu1 %708 }
 0x1cd   : > { %720 = vst.msk [vmem:[#allocation3 + $0x28] sm:$0xff] %vm714_vm1, %v709_v21 }
 0x1ce   : > { %v701_v22 = vpop.xlane.xlu0 %700 }
 0x1cf   : > { %716 = vst.msk [vmem:[#allocation3 + $0x8] sm:$0xff] %vm714_vm1, %v701_v22 }
 0x1d0   : > { %v713_v23 = vpop.xlane.xlu1 %712 }
 0x1d1   : > { %722 = vst.msk [vmem:[#allocation3 + $0x38] sm:$0xff] %vm714_vm1, %v713_v23 }
 0x1d2   : > { %v711_v24 = vpop.xlane.xlu0 %710 }
 0x1d3   : > { %721 = vst.msk [vmem:[#allocation3 + $0x30] sm:$0xff] %vm714_vm1, %v711_v24 }
 0x1d4 PF: > { %v1845_v25 = vld [vmem:[%s2193_s16 + $0x38] sm:$0xff]   ;;  %v1846_v26 = vld [vmem:[%s2193_s16 + $0x30] sm:$0xff]   ;;  %v1847_v27 = vld [vmem:[%s2193_s16 + $0x28] sm:$0xff]   ;;  %v1140_v54 = vlaneseq  ;;  %v2015_v56 = vmov 0   ;;  %s1130_s29 = scalar_lea.vmem %s2195_s8, %s1985_s28 [#allocation7]  ;;  %vm1100_vm2 = vcmask 7168   ;;  %p1577_p7 = scmp.ne.s32.totalorder %s1985_s28, 1 }
 0x1d5   : > { %1680 = vmatprep.subr.bf16.mxu0 %v1845_v25  ;;  %1720 = vmatprep.subr.bf16.mxu1 %v1845_v25  ;;  %v1848_v28 = vld [vmem:[%s2193_s16 + $0x20] sm:$0xff]   ;;  %v1854_v30 = vld [vmem:[#allocation2 + $0x10] sm:$0xff]   ;;  %v1849_v31 = vld [vmem:[%s2193_s16 + $0x18] sm:$0xff]  }
 0x1d6   : > { %1681 = vmatpush3.bf16.msra.mxu0 %v1845_v25  ;;  %1728 = vmatpush3.bf16.msra.mxu1 %v1845_v25  ;;  %v1853_v29 = vld [vmem:[#allocation2] sm:$0xff]   ;;  %v1850_v32 = vld [vmem:[%s2193_s16 + $0x10] sm:$0xff]   ;;  %v1851_v33 = vld [vmem:[%s2193_s16 + $0x8] sm:$0xff]   ;;  %v1141_v58 = vshrl.u32 %v1140_v54, 7 }
 0x1d7   : > { %1682 = vmatprep.subr.bf16.mxu0 %v1846_v26  ;;  %1721 = vmatprep.subr.bf16.mxu1 %v1846_v26  ;;  %v1852_v34 = vld [vmem:[%s2193_s16] sm:$0xff]   ;;  %v1855_v35 = vld [vmem:[#allocation2 + $0x8] sm:$0xff]   ;;  %v1856_v36 = vld [vmem:[#allocation2 + $0x18] sm:$0xff]   ;;  %s1133_s16 = scalar_lea.vmem %s2197_s18, %s1985_s28 [#allocation8] }
 0x1d8   : > { %1696 = vmatprep.mubr.bf16.mxu0 %v1853_v29  ;;  %1700 = vmatprep.mubr.bf16.mxu1 %v1854_v30  ;;  %v1131_v60 = vld [vmem:[%s1130_s29] sm:$0x1]  ;;  %v1142_v62 = vsub.s32 0, %v1141_v58 }
 0x1d9   : > { %1844 = vset.pattern.permute.xlu1 %v2015_v56  ;;  %1843 = vset.pattern.permute.xlu0 %v2015_v56  ;;  %v2318_v54 = vld [vmem:[#allocation4] sm:$0xff] }
 0x1da   : > { %1683 = vmatpush3.bf16.msra.mxu0 %v1846_v26  ;;  %1729 = vmatpush3.bf16.msra.mxu1 %v1846_v26 }
 0x1db   : > { %1684 = vmatprep.subr.bf16.mxu0 %v1847_v27  ;;  %1722 = vmatprep.subr.bf16.mxu1 %v1847_v27 }
 0x1de   : > { %1685 = vmatpush3.bf16.msra.mxu0 %v1847_v27  ;;  %1730 = vmatpush3.bf16.msra.mxu1 %v1847_v27 }
 0x1df   : > { %1686 = vmatprep.subr.bf16.mxu0 %v1848_v28  ;;  %1723 = vmatprep.subr.bf16.mxu1 %v1848_v28 }
 0x1e2   : > { %1687 = vmatpush3.bf16.msra.mxu0 %v1848_v28  ;;  %1731 = vmatpush3.bf16.msra.mxu1 %v1848_v28 }
 0x1e3   : > { %1688 = vmatprep.subr.bf16.mxu0 %v1849_v31  ;;  %1724 = vmatprep.subr.bf16.mxu1 %v1849_v31 }
 0x1e6   : > { %1689 = vmatpush3.bf16.msra.mxu0 %v1849_v31  ;;  %1732 = vmatpush3.bf16.msra.mxu1 %v1849_v31 }
 0x1e7   : > { %1690 = vmatprep.subr.bf16.mxu0 %v1850_v32  ;;  %1725 = vmatprep.subr.bf16.mxu1 %v1850_v32 }
 0x1ea   : > { %1691 = vmatpush3.bf16.msra.mxu0 %v1850_v32  ;;  %1733 = vmatpush3.bf16.msra.mxu1 %v1850_v32 }
 0x1eb   : > { %1692 = vmatprep.subr.bf16.mxu0 %v1851_v33  ;;  %1726 = vmatprep.subr.bf16.mxu1 %v1851_v33 }
 0x1ee   : > { %1693 = vmatpush3.bf16.msra.mxu0 %v1851_v33  ;;  %1734 = vmatpush3.bf16.msra.mxu1 %v1851_v33 }
 0x1ef   : > { %1694 = vmatprep.subr.bf16.mxu0 %v1852_v34  ;;  %1727 = vmatprep.subr.bf16.mxu1 %v1852_v34 }
 0x1f2   : > { %1695 = vmatpush3.bf16.msra.mxu0 %v1852_v34  ;;  %1735 = vmatpush3.bf16.msra.mxu1 %v1852_v34 }
 0x1f5   : > { %1697 = vmatmul.mubr.bf16.vlgmr.msra.gmra.mxu0 %v1855_v35  ;;  %1701 = vmatmul.mubr.bf16.vlgmr.msra.gmra.mxu1 %v1856_v36 }
 0x2b5   : > { %v2272_v37 = vpop.f32.mrf.mxu0  ;;  %v2274_v38 = vpop.f32.mrf.mxu1 }
 0x2b6   : > { %944 = vmax.xlane.f32.xlu1 %v2272_v37  ;;  %v1119_v46 = vmax.f32 %v2272_v37, %v2274_v38 }
 0x2b7   : > { %v2277_v39 = vpop.f32.mrf.mxu0  ;;  %v2279_v40 = vpop.f32.mrf.mxu1 }
 0x2b8   : > { %940 = vmax.xlane.f32.xlu0 %v2277_v39  ;;  %v1117_v47 = vmax.f32 %v2277_v39, %v2279_v40 }
 0x2b9   : > { %v2282_v41 = vpop.f32.mrf.mxu0  ;;  %v2284_v42 = vpop.f32.mrf.mxu1 }
 0x2ba   : > { %v1120_v43 = vmax.f32 %v2282_v41, %v2284_v42  ;;  %946 = vmax.xlane.f32.xlu1 %v2282_v41 }
 0x2bb   : > { %v2289_v44 = vpop.f32.mrf.mxu0  ;;  %v2291_v45 = vpop.f32.mrf.mxu1 }
 0x2bc   : > { %v1118_v48 = vmax.f32 %v2289_v44, %v2291_v45  ;;  %948 = vmax.xlane.f32.xlu0 %v2279_v40  ;;  %v1122_v49 = vmax.f32 %v1119_v46, %v1120_v43 }
 0x2be   : > { %v1121_v50 = vmax.f32 %v1117_v47, %v1118_v48  ;;  %950 = vmax.xlane.f32.xlu1 %v2291_v45  ;;  %v1134_v47 = vld [vmem:[%s1133_s16] sm:$0x1] }
 0x2c0   : > { %v1123_v51 = vmax.f32 %v1121_v50, %v1122_v49  ;;  %942 = vmax.xlane.f32.xlu0 %v2289_v44 }
 0x2c2   : > { %v1124_v52 = vrot.slane %v1123_v51, 4  ;;  %954 = vmax.xlane.f32.xlu1 %v2284_v42 }
 0x2c4   : > { %v1125_v53 = vmax.f32 %v1123_v51, %v1124_v52  ;;  %952 = vmax.xlane.f32.xlu0 %v2274_v38  ;;  %v2316_v52 = vld [vmem:[#allocation4 + $0x10] sm:$0xff] }
 0x2c6   : > { %v1126_v55 = vrot.slane %v1125_v53, 2 }
 0x2c8   : > { %v1127_v57 = vmax.f32 %v1125_v53, %v1126_v55 }
 0x2ca   : > { %v1128_v59 = vrot.slane %v1127_v57, 1 }
 0x2cc   : > { %v1129_v61 = vmax.f32 %v1127_v57, %v1128_v59  ;;  %v2323_v57 = vld [vmem:[#allocation4 + $0x18] sm:$0xff] }
 0x2ce   : > { %v1132_v63 = vmax.f32 %v1131_v60, %v1129_v61  ;;  %v2333_v61 = vld [vmem:[#allocation4 + $0x20] sm:$0xff] }
 0x2d0   : > { %v1143_v0 = vrot.slane %v1132_v63, %v1142_v62  ;;  %1184 = vst [vmem:[%s1130_s29] sm:$0x1] %v1132_v63  ;;  %v1135_v19 = vsub.f32 %v1131_v60, %v1132_v63 }
 0x2d2   : > { %v1145_v1 = vsub.f32 %v2277_v39, %v1143_v0  ;;  %v1146_v2 = vsub.f32 %v2289_v44, %v1143_v0  ;;  %v1147_v3 = vsub.f32 %v2272_v37, %v1143_v0  ;;  %v1148_v4 = vsub.f32 %v2282_v41, %v1143_v0 }
 0x2d3   : > { %v1149_v7 = vsub.f32 %v2279_v40, %v1143_v0  ;;  %v1150_v9 = vsub.f32 %v2291_v45, %v1143_v0  ;;  %v1151_v11 = vsub.f32 %v2274_v38, %v1143_v0  ;;  %v1152_v13 = vsub.f32 %v2284_v42, %v1143_v0 }
 0x2d4   : > { %v1153_v5 = vmul.f32 1.442695, %v1145_v1  ;;  %v1155_v6 = vmul.f32 1.442695, %v1146_v2  ;;  %v1157_v8 = vmul.f32 1.442695, %v1147_v3 }
 0x2d5   : > { %v1159_v10 = vmul.f32 1.442695, %v1148_v4  ;;  %v1161_v12 = vmul.f32 1.442695, %v1149_v7  ;;  %v1163_v14 = vmul.f32 1.442695, %v1150_v9 }
 0x2d6   : > { %1857 = vpow2.f32 %v1153_v5  ;;  %v1165_v15 = vmul.f32 1.442695, %v1151_v11  ;;  %v1167_v16 = vmul.f32 1.442695, %v1152_v13  ;;  %v1136_v24 = vmul.f32 1.442695, %v1135_v19 }
 0x2d7   : > { %1859 = vpow2.f32 %v1155_v6  ;;  %v2343_v1 = vld [vmem:[#allocation4 + $0x28] sm:$0xff]  ;;  %v2361_v9 = vld [vmem:[#allocation4 + $0x38] sm:$0xff]  ;;  %v2370_v13 = vld [vmem:[#allocation4 + $0x30] sm:$0xff] }
 0x2d8   : > { %1861 = vpow2.f32 %v1157_v8  ;;  %v2352_v5 = vld [vmem:[#allocation4 + $0x8] sm:$0xff] }
 0x2d9   : > { %1863 = vpow2.f32 %v1159_v10 }
 0x2da   : > { %1865 = vpow2.f32 %v1161_v12 }
 0x2db   : > { %1867 = vpow2.f32 %v1163_v14 }
 0x2dc   : > { %1869 = vpow2.f32 %v1165_v15 }
 0x2dd   : > { %1871 = vpow2.f32 %v1167_v16 }
 0x2de   : > { %1873 = vpow2.f32 %v1136_v24 }
 0x2e3   : > { %v1858_v17 = vpop.eup %1857 }
 0x2e4   : > { %v1860_v18 = vpop.eup %1859 }
 0x2e5   : > { %v1169_v20 = vadd.f32 %v1860_v18, %v1858_v17  ;;  %v1862_v21 = vpop.eup %1861 }
 0x2e6   : > { %v1864_v23 = vpop.eup %1863 }
 0x2e7   : > { %v1170_v22 = vadd.f32 %v1862_v21, %v1169_v20  ;;  %v1866_v26 = vpop.eup %1865 }
 0x2e8   : > { %v1868_v28 = vpop.eup %1867 }
 0x2e9   : > { %v1171_v25 = vadd.f32 %v1864_v23, %v1170_v22  ;;  %v1870_v30 = vpop.eup %1869 }
 0x2ea   : > { %v1872_v32 = vpop.eup %1871 }
 0x2eb   : > { %v1172_v27 = vadd.f32 %v1866_v26, %v1171_v25  ;;  %v1874_v46 = vpop.eup %1873 }
 0x2ec   : > { %v1138_v49 = vmul.f32 %v1874_v46, %v1134_v47 }
 0x2ed   : > { %v1173_v29 = vadd.f32 %v1868_v28, %v1172_v27 }
 0x2ef   : > { %v1174_v31 = vadd.f32 %v1870_v30, %v1173_v29 }
 0x2f1   : > { %v1175_v33 = vadd.f32 %v1872_v32, %v1174_v31 }
 0x2f3   : > { %v1176_v34 = vrot.slane %v1175_v33, 4 }
 0x2f5   : > { %v1177_v35 = vadd.f32 %v1176_v34, %v1175_v33 }
 0x2f7   : > { %v1178_v36 = vrot.slane %v1177_v35, 2 }
 0x2f9   : > { %v1179_v43 = vadd.f32 %v1178_v36, %v1177_v35 }
 0x2fb   : > { %v1180_v48 = vrot.slane %v1179_v43, 1 }
 0x2fd   : > { %v1181_v50 = vadd.f32 %v1180_v48, %v1179_v43 }
 0x2ff   : > { %v1182_v51 = vadd.f32 %v1181_v50, %v1138_v49 }
 0x301   : > { %1183 = vst [vmem:[%s1133_s16] sm:$0x1] %v1182_v51 }
 0x33f   : > { %v945_v53 = vpop.xlane.xlu1 %944 }
 0x340   : > { %v2321_v55 = vmax.f32 %v2316_v52, %v945_v53 }
 0x341   : > { %v941_v56 = vpop.xlane.xlu0 %940 }
 0x342   : > { %v982_v58 = vsub.f32 %v2316_v52, %v2321_v55  ;;  %1111 = vst.msk [vmem:[#allocation4 + $0x10] sm:$0xff] %vm1100_vm2, %v2321_v55  ;;  %v2330_v59 = vmax.f32 %v2318_v54, %v941_v56  ;;  %1024 = vperm.xlu1 %1844, %v2321_v55  }
 0x343   : > { %v947_v60 = vpop.xlane.xlu1 %946 }
 0x344   : > { %v980_v62 = vsub.f32 %v2318_v54, %v2330_v59  ;;  %1109 = vst.msk [vmem:[#allocation4] sm:$0xff] %vm1100_vm2, %v2330_v59  ;;  %v2340_v63 = vmax.f32 %v2323_v57, %v947_v60  ;;  %1014 = vperm.xlu0 %1843, %v2330_v59  }
 0x345   : > { %v949_v0 = vpop.xlane.xlu0 %948 }
 0x346   : > { %v983_v2 = vsub.f32 %v2323_v57, %v2340_v63  ;;  %1112 = vst.msk [vmem:[#allocation4 + $0x18] sm:$0xff] %vm1100_vm2, %v2340_v63  ;;  %v2350_v3 = vmax.f32 %v2333_v61, %v949_v0  ;;  %v974_v0 = vld [vmem:[#allocation5 + $0x10] sm:$0xff] }
 0x347   : > { %v951_v4 = vpop.xlane.xlu1 %950 }
 0x348   : > { %v984_v6 = vsub.f32 %v2333_v61, %v2350_v3  ;;  %1113 = vst.msk [vmem:[#allocation4 + $0x20] sm:$0xff] %vm1100_vm2, %v2350_v3  ;;  %v2359_v7 = vmax.f32 %v2343_v1, %v951_v4  ;;  %v994_v52 = vmul.f32 1.442695, %v983_v2 }
 0x349   : > { %v943_v8 = vpop.xlane.xlu0 %942 }
 0x34a   : > { %v985_v10 = vsub.f32 %v2343_v1, %v2359_v7  ;;  %1114 = vst.msk [vmem:[#allocation4 + $0x28] sm:$0xff] %vm1100_vm2, %v2359_v7  ;;  %v2368_v11 = vmax.f32 %v2352_v5, %v943_v8  ;;  %v996_v4 = vmul.f32 1.442695, %v984_v6 }
 0x34b   : > { %v955_v12 = vpop.xlane.xlu1 %954 }
 0x34c   : > { %v981_v14 = vsub.f32 %v2352_v5, %v2368_v11  ;;  %1110 = vst.msk [vmem:[#allocation4 + $0x8] sm:$0xff] %vm1100_vm2, %v2368_v11  ;;  %v2377_v15 = vmax.f32 %v2361_v9, %v955_v12  ;;  %v972_v12 = vld [vmem:[#allocation5] sm:$0xff] }
 0x34d   : > { %v953_v16 = vpop.xlane.xlu0 %952 }
 0x34e   : > { %v987_v17 = vsub.f32 %v2361_v9, %v2377_v15  ;;  %1116 = vst.msk [vmem:[#allocation4 + $0x38] sm:$0xff] %vm1100_vm2, %v2377_v15  ;;  %v2384_v18 = vmax.f32 %v2370_v13, %v953_v16  ;;  %v990_v61 = vmul.f32 1.442695, %v981_v14  ;;  %v975_v14 = vld [vmem:[#allocation5 + $0x18] sm:$0xff] }
 0x350   : > { %v986_v19 = vsub.f32 %v2370_v13, %v2384_v18  ;;  %1115 = vst.msk [vmem:[#allocation4 + $0x30] sm:$0xff] %vm1100_vm2, %v2384_v18  ;;  %1044 = vperm.xlu1 %1844, %v2384_v18   ;;  %v973_v18 = vld [vmem:[#allocation5 + $0x8] sm:$0xff] }
 0x352   : > { %v1000_v57 = vmul.f32 1.442695, %v986_v19 }
 0x354   : > { %1034 = vperm.xlu1 %1844, %v2350_v3   ;;  %v976_v3 = vld [vmem:[#allocation5 + $0x20] sm:$0xff] }
 0x358   : > { %1029 = vperm.xlu1 %1844, %v2340_v63   ;;  %v1002_v63 = vmul.f32 1.442695, %v987_v17 }
 0x35c   : > { %1019 = vperm.xlu1 %1844, %v2368_v11  }
 0x360   : > { %1039 = vperm.xlu1 %1844, %v2359_v7  }
 0x364   : > { %1049 = vperm.xlu1 %1844, %v2377_v15  }
 0x3bd   : > { %v1025_v20 = vpop.permute.xlu1 %1024 }
 0x3be   : > { %v1054_v21 = vsub.f32 %v2272_v37, %v1025_v20 }
 0x3bf   : > { %v1015_v22 = vpop.permute.xlu0 %1014 }
 0x3c0   : > { %v1064_v23 = vmul.f32 1.442695, %v1054_v21  ;;  %v1052_v24 = vsub.f32 %v2277_v39, %v1015_v22  ;;  %v977_v22 = vld [vmem:[#allocation5 + $0x28] sm:$0xff] }
 0x3c2   : > { %1875 = vpow2.f32 %v1064_v23  ;;  %v1060_v25 = vmul.f32 1.442695, %v1052_v24  ;;  %v978_v23 = vld [vmem:[#allocation5 + $0x30] sm:$0xff] }
 0x3c4   : > { %1877 = vpow2.f32 %v1060_v25 }
 0x3cb   : > { %v1045_v26 = vpop.permute.xlu1 %1044 }
 0x3cc   : > { %v1058_v34 = vsub.f32 %v2274_v38, %v1045_v26 }
 0x3ce   : > { %v1072_v43 = vmul.f32 1.442695, %v1058_v34 }
 0x3cf   : > { %v1876_v27 = vpop.eup %1875  ;;  %v1035_v28 = vpop.permute.xlu1 %1034 }
 0x3d0   : > { %v1056_v29 = vsub.f32 %v2279_v40, %v1035_v28  ;;  %1080 = vadd.xlane.f32.xlu0 %v1876_v27 }
 0x3d1   : > { %v1878_v30 = vpop.eup %1877 }
 0x3d2   : > { %v1068_v31 = vmul.f32 1.442695, %v1056_v29  ;;  %1076 = vadd.xlane.f32.xlu1 %v1878_v30  ;;  %v979_v30 = vld [vmem:[#allocation5 + $0x38] sm:$0xff] }
 0x3d3   : > { %v1030_v32 = vpop.permute.xlu1 %1029 }
 0x3d4   : > { %1879 = vpow2.f32 %v1068_v31  ;;  %v1055_v37 = vsub.f32 %v2282_v41, %v1030_v32 }
 0x3d6   : > { %v1066_v33 = vmul.f32 1.442695, %v1055_v37 }
 0x3d7   : > { %v1020_v39 = vpop.permute.xlu1 %1019 }
 0x3d8   : > { %1881 = vpow2.f32 %v1066_v33  ;;  %v1053_v35 = vsub.f32 %v2289_v44, %v1020_v39 }
 0x3da   : > { %v1062_v36 = vmul.f32 1.442695, %v1053_v35 }
 0x3db   : > { %v1040_v46 = vpop.permute.xlu1 %1039 }
 0x3dc   : > { %1883 = vpow2.f32 %v1062_v36  ;;  %v1057_v40 = vsub.f32 %v2291_v45, %v1040_v46  ;;  %v992_v45 = vmul.f32 1.442695, %v982_v58 }
 0x3dd   : > { %1885 = vpow2.f32 %v1072_v43 }
 0x3de   : > { %v1070_v47 = vmul.f32 1.442695, %v1057_v40 }
 0x3df   : > { %v1050_v48 = vpop.permute.xlu1 %1049 }
 0x3e0   : > { %1887 = vpow2.f32 %v1070_v47  ;;  %v1059_v49 = vsub.f32 %v2284_v42, %v1050_v48  ;;  %v988_v42 = vmul.f32 1.442695, %v980_v62  ;;  %v998_v62 = vmul.f32 1.442695, %v985_v10 }
 0x3e1   : > { %v1880_v41 = vpop.eup %1879 }
 0x3e2   : > { %v1074_v50 = vmul.f32 1.442695, %v1059_v49  ;;  %1084 = vadd.xlane.f32.xlu0 %v1880_v41 }
 0x3e4   : > { %1889 = vpow2.f32 %v1074_v50 }
 0x3e5   : > { %v1882_v38 = vpop.eup %1881  ;;  %1891 = vpow2.f32 %v992_v45 }
 0x3e6   : > { %1082 = vadd.xlane.f32.xlu1 %v1882_v38  ;;  %1893 = vpow2.f32 %v988_v42 }
 0x3e7   : > { %1895 = vpow2.f32 %v996_v4 }
 0x3e8   : > { %1897 = vpow2.f32 %v994_v52 }
 0x3e9   : > { %v1884_v51 = vpop.eup %1883  ;;  %1899 = vpow2.f32 %v990_v61 }
 0x3ea   : > { %1078 = vadd.xlane.f32.xlu0 %v1884_v51  ;;  %v1886_v44 = vpop.eup %1885  ;;  %1901 = vpow2.f32 %v998_v62 }
 0x3eb   : > { %1903 = vpow2.f32 %v1000_v57 }
 0x3ec   : > { %1905 = vpow2.f32 %v1002_v63 }
 0x3ed   : > { %v1888_v53 = vpop.eup %1887 }
 0x3ee   : > { %1088 = vadd.xlane.f32.xlu0 %v1886_v44  ;;  %1086 = vadd.xlane.f32.xlu1 %v1888_v53 }
 0x3f1   : > { %v1890_v56 = vpop.eup %1889 }
 0x3f2   : > { %1090 = vadd.xlane.f32.xlu1 %v1890_v56  ;;  %v1892_v60 = vpop.eup %1891 }
 0x3f3   : > { %v1894_v8 = vpop.eup %1893  ;;  %v1006_v16 = vmul.f32 %v1892_v60, %v974_v0 }
 0x3f4   : > { %v1004_v54 = vmul.f32 %v1894_v8, %v972_v12  ;;  %v1896_v2 = vpop.eup %1895 }
 0x3f5   : > { %v1008_v5 = vmul.f32 %v1896_v2, %v976_v3  ;;  %v1898_v6 = vpop.eup %1897 }
 0x3f6   : > { %v1007_v7 = vmul.f32 %v1898_v6, %v975_v14  ;;  %v1900_v10 = vpop.eup %1899 }
 0x3f7   : > { %v1902_v21 = vpop.eup %1901  ;;  %v1005_v9 = vmul.f32 %v1900_v10, %v973_v18 }
 0x3f8   : > { %v1904_v15 = vpop.eup %1903  ;;  %v1009_v25 = vmul.f32 %v1902_v21, %v977_v22 }
 0x3f9   : > { %v1010_v26 = vmul.f32 %v1904_v15, %v978_v23  ;;  %v1906_v27 = vpop.eup %1905 }
 0x3fa   : > { %v1011_v37 = vmul.f32 %v1906_v27, %v979_v30 }
 0x459   : > { %v1081_v20 = vpop.xlane.xlu0 %1080 }
 0x45a   : > { %v1094_v55 = vadd.f32 %v1081_v20, %v1006_v16 }
 0x45b   : > { %v1077_v58 = vpop.xlane.xlu1 %1076 }
 0x45c   : > { %1103 = vst.msk [vmem:[#allocation5 + $0x10] sm:$0xff] %vm1100_vm2, %v1094_v55  ;;  %v1092_v59 = vadd.f32 %v1077_v58, %v1004_v54 }
 0x45e   : > { %1101 = vst.msk [vmem:[#allocation5] sm:$0xff] %vm1100_vm2, %v1092_v59 }
 0x46b   : > { %v1085_v11 = vpop.xlane.xlu0 %1084 }
 0x46c   : > { %v1096_v1 = vadd.f32 %v1085_v11, %v1008_v5 }
 0x46e   : > { %1105 = vst.msk [vmem:[#allocation5 + $0x20] sm:$0xff] %vm1100_vm2, %v1096_v1 }
 0x46f   : > { %v1083_v13 = vpop.xlane.xlu1 %1082 }
 0x470   : > { %v1095_v19 = vadd.f32 %v1083_v13, %v1007_v7 }
 0x472   : > { %1104 = vst.msk [vmem:[#allocation5 + $0x18] sm:$0xff] %vm1100_vm2, %v1095_v19 }
 0x473   : > { %v1079_v17 = vpop.xlane.xlu0 %1078 }
 0x474   : > { %v1093_v24 = vadd.f32 %v1079_v17, %v1005_v9 }
 0x476   : > { %1102 = vst.msk [vmem:[#allocation5 + $0x8] sm:$0xff] %vm1100_vm2, %v1093_v24 }
 0x477   : > { %v1087_v28 = vpop.xlane.xlu1 %1086  ;;  %v1089_v29 = vpop.xlane.xlu0 %1088 }
 0x478   : > { %v1097_v31 = vadd.f32 %v1087_v28, %v1009_v25  ;;  %v1098_v32 = vadd.f32 %v1089_v29, %v1010_v26 }
 0x47a   : > { %1106 = vst.msk [vmem:[#allocation5 + $0x28] sm:$0xff] %vm1100_vm2, %v1097_v31  ;;  %1107 = vst.msk [vmem:[#allocation5 + $0x30] sm:$0xff] %vm1100_vm2, %v1098_v32  ;;  %1188 = sbr.rel (%p1577_p7) target bundleno = 1392 (0x570), region = 93 }
 0x47b   : > { %v1091_v33 = vpop.xlane.xlu1 %1090 }
 0x47c   : > { %v1099_v34 = vadd.f32 %v1091_v33, %v1011_v37 }
 0x47e   : > { %1108 = vst.msk [vmem:[#allocation5 + $0x38] sm:$0xff] %vm1100_vm2, %v1099_v34 }
 0x47f   : > { %v1197_v39 = vld [vmem:[#allocation5] sm:$0xff]  ;;  %v1198_v35 = vld [vmem:[#allocation5 + $0x8] sm:$0xff]  ;;  %v1199_v36 = vld [vmem:[#allocation5 + $0x10] sm:$0xff]  ;;  %vm1280_vm3 = vcmask 0  }
 0x480   : > { %v1200_v43 = vld [vmem:[#allocation5 + $0x18] sm:$0xff]  ;;  %1907 = vlog2.f32 %v1197_v39  ;;  %v1201_v46 = vld [vmem:[#allocation5 + $0x20] sm:$0xff]  ;;  %v1230_v41 = vld [vmem:[#allocation3 + $0x8] sm:$0xff] }
 0x481   : > { %1909 = vlog2.f32 %v1198_v35  ;;  %v1202_v40 = vld [vmem:[#allocation5 + $0x28] sm:$0xff]  ;;  %v1203_v47 = vld [vmem:[#allocation5 + $0x30] sm:$0xff]  ;;  %v1229_v49 = vld [vmem:[#allocation3] sm:$0xff]  ;;  %v1238_v16 = vmul.f32 2.0, %v1230_v41 }
 0x482   : > { %1911 = vlog2.f32 %v1199_v36  ;;  %v1189_v38 = vld [vmem:[#allocation4] sm:$0xff]  ;;  %v1231_v51 = vld [vmem:[#allocation3 + $0x10] sm:$0xff]  ;;  %v1190_v53 = vld [vmem:[#allocation4 + $0x8] sm:$0xff]  ;;  %v1237_v60 = vmul.f32 2.0, %v1229_v49 }
 0x483   : > { %1913 = vlog2.f32 %v1200_v43  ;;  %v1232_v45 = vld [vmem:[#allocation3 + $0x18] sm:$0xff]  ;;  %v1233_v42 = vld [vmem:[#allocation3 + $0x20] sm:$0xff]  ;;  %v1191_v4 = vld [vmem:[#allocation4 + $0x10] sm:$0xff]  ;;  %v1239_v59 = vmul.f32 2.0, %v1231_v51 }
 0x484   : > { %1915 = vlog2.f32 %v1201_v46  ;;  %v1234_v12 = vld [vmem:[#allocation3 + $0x28] sm:$0xff]  ;;  %v1192_v52 = vld [vmem:[#allocation4 + $0x18] sm:$0xff]  ;;  %v1235_v58 = vld [vmem:[#allocation3 + $0x30] sm:$0xff]  ;;  %v1240_v2 = vmul.f32 2.0, %v1232_v45  ;;  %v1241_v3 = vmul.f32 2.0, %v1233_v42 }
 0x485   : > { %v1204_v48 = vld [vmem:[#allocation5 + $0x38] sm:$0xff]  ;;  %1917 = vlog2.f32 %v1202_v40  ;;  %v1193_v62 = vld [vmem:[#allocation4 + $0x20] sm:$0xff]  ;;  %v1194_v6 = vld [vmem:[#allocation4 + $0x28] sm:$0xff]  ;;  %v1242_v1 = vmul.f32 2.0, %v1234_v12  ;;  %v1243_v21 = vmul.f32 2.0, %v1235_v58 }
 0x486   : > { %1919 = vlog2.f32 %v1203_v47  ;;  %v1195_v13 = vld [vmem:[#allocation4 + $0x30] sm:$0xff]  ;;  %v1196_v17 = vld [vmem:[#allocation4 + $0x38] sm:$0xff]  ;;  %v1277_v12 = vld [vmem:[%s2181_s10] sm:$0x1] }
 0x487   : > { %1921 = vlog2.f32 %v1204_v48  ;;  %v1236_v24 = vld [vmem:[#allocation3 + $0x38] sm:$0xff] }
 0x488   : > { %v1244_v39 = vmul.f32 2.0, %v1236_v24 }
 0x48d   : > { %v1908_v50 = vpop.eup %1907 }
 0x48e   : > { %v1910_v44 = vpop.eup %1909  ;;  %v1206_v56 = vmul.f32 0.6931472, %v1908_v50 }
 0x48f   : > { %v1912_v0 = vpop.eup %1911  ;;  %v1208_v8 = vmul.f32 0.6931472, %v1910_v44 }
 0x490   : > { %v1914_v20 = vpop.eup %1913  ;;  %v1210_v55 = vmul.f32 0.6931472, %v1912_v0  ;;  %v1221_v54 = vadd.f32 %v1206_v56, %v1189_v38 }
 0x491   : > { %v1916_v61 = vpop.eup %1915  ;;  %v1212_v57 = vmul.f32 0.6931472, %v1914_v20  ;;  %v1222_v63 = vadd.f32 %v1208_v8, %v1190_v53 }
 0x492   : > { %v1918_v5 = vpop.eup %1917  ;;  %v1214_v11 = vmul.f32 0.6931472, %v1916_v61  ;;  %v1223_v14 = vadd.f32 %v1210_v55, %v1191_v4  ;;  %v1245_v7 = vsub.f32 %v1221_v54, %v1237_v60 }
 0x493   : > { %v1920_v10 = vpop.eup %1919  ;;  %v1216_v18 = vmul.f32 0.6931472, %v1918_v5  ;;  %v1224_v19 = vadd.f32 %v1212_v57, %v1192_v52  ;;  %v1246_v9 = vsub.f32 %v1222_v63, %v1238_v16 }
 0x494   : > { %v1922_v15 = vpop.eup %1921  ;;  %v1218_v22 = vmul.f32 0.6931472, %v1920_v10  ;;  %v1225_v23 = vadd.f32 %v1214_v11, %v1193_v62  ;;  %v1247_v25 = vsub.f32 %v1223_v14, %v1239_v59  ;;  %v1253_v26 = vsel %vm1100_vm2, %v1245_v7, 0.0 }
 0x495   : > { %v1220_v27 = vmul.f32 0.6931472, %v1922_v15  ;;  %v1226_v28 = vadd.f32 %v1216_v18, %v1194_v6  ;;  %v1248_v29 = vsub.f32 %v1224_v19, %v1240_v2  ;;  %v1254_v30 = vsel %vm1100_vm2, %v1246_v9, 0.0 }
 0x496   : > { %v1227_v31 = vadd.f32 %v1218_v22, %v1195_v13  ;;  %v1249_v32 = vsub.f32 %v1225_v23, %v1241_v3  ;;  %v1255_v37 = vadd.f32 %v1254_v30, %v1253_v26  ;;  %v1256_v33 = vsel %vm1100_vm2, %v1247_v25, 0.0 }
 0x497   : > { %v1228_v34 = vadd.f32 %v1220_v27, %v1196_v17  ;;  %v1250_v35 = vsub.f32 %v1226_v28, %v1242_v1  ;;  %v1258_v36 = vsel %vm1100_vm2, %v1248_v29, 0.0 }
 0x498   : > { %v1257_v43 = vadd.f32 %v1256_v33, %v1255_v37  ;;  %v1251_v46 = vsub.f32 %v1227_v31, %v1243_v21  ;;  %v1260_v40 = vsel %vm1100_vm2, %v1249_v32, 0.0 }
 0x499   : > { %v1252_v48 = vsub.f32 %v1228_v34, %v1244_v39  ;;  %v1262_v49 = vsel %vm1100_vm2, %v1250_v35, 0.0 }
 0x49a   : > { %v1259_v47 = vadd.f32 %v1258_v36, %v1257_v43  ;;  %v1264_v50 = vsel %vm1100_vm2, %v1251_v46, 0.0 }
 0x49b   : > { %v1266_v51 = vsel %vm1100_vm2, %v1252_v48, 0.0 }
 0x49c   : > { %v1261_v41 = vadd.f32 %v1260_v40, %v1259_v47 }
 0x49e   : > { %v1263_v38 = vadd.f32 %v1262_v49, %v1261_v41 }
 0x4a0   : > { %v1265_v44 = vadd.f32 %v1264_v50, %v1263_v38 }
 0x4a2   : > { %v1267_v53 = vadd.f32 %v1266_v51, %v1265_v44 }
 0x4a4   : > { %1268 = vadd.xlane.f32.xlu0 %v1267_v53 }
 0x52d   : > { %v1269_v56 = vpop.xlane.xlu0 %1268 }
 0x52e   : > { %v1270_v45 = vrot.slane %v1269_v56, 4 }
 0x530   : > { %v1271_v42 = vadd.f32 %v1270_v45, %v1269_v56 }
 0x532   : > { %v1272_v60 = vrot.slane %v1271_v42, 2 }
 0x534   : > { %v1273_v0 = vadd.f32 %v1272_v60, %v1271_v42 }
 0x536   : > { %v1274_v4 = vrot.slane %v1273_v0, 1 }
 0x538   : > { %v1275_v8 = vadd.f32 %v1274_v4, %v1273_v0 }
 0x53a   : > { %1736 = vpush %v1275_v8 }
 0x56b   : > { %s1737_s28 = spop %1736 }
 0x56c   : > { %v1278_v16 = vstv %s1737_s28 }
 0x56d   : > { %v1279_v20 = vadd.f32 %v1278_v16, %v1277_v12 }
 0x56f   : > { %1281 = vst.msk [vmem:[%s2181_s10] sm:$0x1] %vm1280_vm3, %v1279_v20 }
 0x570 PF: > { %1298 = sbr.rel (!%p2134_p9) target bundleno = 1397 (0x575), region = 101  ;;  %s1299_s24 = scalar_lea.vmem (%p2134_p9), %s2502_s6, %s1993_s30  ;;  %v1316_v52 = vld [vmem:[%s2195_s8] sm:$0x1] (%p2134_p9)  ;;  %v1318_v55 = vld [vmem:[%s2195_s8 + $0x1] sm:$0x1] (%p2134_p9) }
 0x571   : > { %1317 = vst [vmem:[%s1299_s24] sm:$0x1] (%p2134_p9), %v1316_v52  ;;  %1319 = vst [vmem:[%s1299_s24 + $0x2] sm:$0x1] (%p2134_p9), %v1318_v55 }
 0x575 PF: > { %1339 = sbr.rel (!%p2134_p9) target bundleno = 1402 (0x57a), region = 135  ;;  %s1340_s14 = scalar_lea.vmem (%p2134_p9), %s2503_s7, %s1993_s30  ;;  %v1357_v54 = vld [vmem:[%s2197_s18] sm:$0x1] (%p2134_p9)  ;;  %v1359_v58 = vld [vmem:[%s2197_s18 + $0x1] sm:$0x1] (%p2134_p9) }
 0x576   : > { %1358 = vst [vmem:[%s1340_s14] sm:$0x1] (%p2134_p9), %v1357_v54  ;;  %1360 = vst [vmem:[%s1340_s14 + $0x2] sm:$0x1] (%p2134_p9), %v1359_v58 }
 0x57a PF: > { %s18_s11 = sadd.s32 1, %s2009_s11   ;;  %s2519_s8 = sld [smem:[#allocation14_spill]] }
 0x57b   : > { %p15_p8 = scmp.ge.s32.totalorder %s18_s11, 10   ;;  %s2520_s28 = sld [smem:[#allocation9_spill]] }
 0x57c   : > { %s2521_s29 = sld [smem:[#allocation10_spill]]  ;;  %s2526_s24 = smov %s1973_s25 }
 0x57d   : > { %s2522_s30 = sld [smem:[#allocation11_spill]]  ;;  %s2527_s25 = smov %s2142_s22 }
 0x57e   : > { %s2523_s19 = sld [smem:[#allocation12_spill]]  ;;  %s2528_s26 = smov %s1981_s27 }
 0x57f   : > { %s2524_s9 = sld [smem:[#allocation13_spill]] }
 0x580   : > { %s2525_s10 = sld [smem:[#allocation15_spill]]  ;;  %s2529_s27 = smov %s2519_s8 }
 0x581   :  { %17 = sbr.rel (!%p15_p8) target bundleno = 8 (0x8), region = 228 }
 0x584   : > { %s2530_s8 = smov %s2523_s19 }

</bundles_post_ra>
